<compile_context>
chip_gen: v6e
topology: v6e:2x2x1
jax: 0.10.0
libtpu: 0.0.40
codegen_flags: <defaults>
</compile_context>

<pallas_src>
import functools

import jax
import jax.numpy as jnp
from jax.experimental import pallas as pl
from jax.experimental.pallas import tpu as pltpu

_LANE = 128
_SUBLANE = 8
_GROUP = _LANE * _SUBLANE  # 1024 rows = one fully dense (8,128) f32 tile per feature


def _round_up(x, m):
    return ((x + m - 1) // m) * m


def _pick_tiles(batch, block_rows):
    """Pad batch to a multiple of 1024 and pick an (8,128)-dense tile size."""
    bp = _round_up(batch, _GROUP)
    tb = min(_round_up(max(block_rows, _GROUP), _GROUP), bp)
    # Keep >= 2 parallel tiles when there is enough work so v7x's two
    # TensorCores both stream batch tiles (dimension_semantics="parallel").
    if bp // tb < 2 and bp >= 2 * _GROUP:
        tb = _round_up(bp // 2, _GROUP)
    bp = _round_up(bp, tb)
    return bp, tb


def _make_hnn_kernel(dim, hidden):
    """VPU broadcast-FMA formulation of the HNN symplectic gradient.

    Refs (in order):
      w1_ref   : (hidden*dim,) f32 SMEM, row-major [h, d]  — first-layer weight
      b1_ref   : (hidden,)     f32 SMEM                    — first-layer bias
      wsym_ref : (dim*hidden,) f32 SMEM, row-major [d, h]  — (W1 @ P)^T * w2
      x_ref    : (dim, TBr, 128) f32 VMEM                  — batch tile (feature-major)
      o_ref    : (dim, TBr, 128) f32 VMEM                  — output tile
    """
    def kernel(w1_ref, b1_ref, wsym_ref, x_ref, o_ref):
        feats = [x_ref[d] for d in range(dim)]          # (TBr, 128) each, dense
        acc = [None] * dim
        for h in range(hidden):                         # fully unrolled, hidden=32
            z = None
            for d in range(dim):
                term = w1_ref[h * dim + d] * feats[d]   # scalar-broadcast FMA (VPU)
                z = term if z is None else z + term
            z = z + b1_ref[h]
            t = jnp.tanh(z)                             # EUP slot
            s = 1.0 - t * t                             # w2 already folded into wsym
            for d in range(dim):
                term = wsym_ref[d * hidden + h] * s
                acc[d] = term if acc[d] is None else acc[d] + term
        for d in range(dim):
            o_ref[d] = acc[d].astype(o_ref.dtype)       # unmasked, lane-dense stores
    return kernel


def prepare_hnn_params(w1, b1, w2, *, n):
    """One-time host-side weight prep (hoisted out of the per-step forward).

    Folds the symplectic permutation/sign and the output weight w2 into a
    single second-contraction weight:
        out_fm = Wsym_scaled @ (1 - tanh(W1 x + b1)^2),
        Wsym_scaled[d, h] = [W1[:, n:], -W1[:, :n]]^T[d, h] * w2[h].
    Returns flat f32 arrays ready for the kernel's SMEM operands.
    """
    hidden, dim = w1.shape
    assert dim == 2 * n and b1.shape == (hidden,) and w2.reshape(-1).shape == (hidden,)
    w1f = w1.astype(jnp.float32)
    w1_flat = w1f.reshape(-1)                                        # [h, d]
    b1_flat = b1.astype(jnp.float32).reshape(-1)                     # [h]
    wsym = jnp.concatenate([w1f[:, n:], -w1f[:, :n]], axis=1).T      # (2n, hidden)
    wsym_flat = (wsym * w2.astype(jnp.float32).reshape(1, -1)).reshape(-1)  # [d, h]
    return w1_flat, b1_flat, wsym_flat


@functools.partial(jax.jit, static_argnames=("block_rows",))
def hnn_mass_spring_fm(x_fm, w1_flat, b1_flat, wsym_flat, *, block_rows=8192):
    """Feature-major fast path: x_fm is (2n, B); returns the (2n, B) symplectic
    gradient. Keeping state feature-major across calls avoids all transposes."""
    dim, batch = x_fm.shape
    hidden = b1_flat.shape[0]

    bp, tb = _pick_tiles(batch, block_rows)
    if bp != batch:
        x_fm = jnp.pad(x_fm, ((0, 0), (0, bp - batch)))
    tbr = tb // _LANE
    # Contiguous split of the minor axis: metadata-only reshape, no data movement.
    x3 = x_fm.reshape(dim, bp // _LANE, _LANE)
    grid = (bp // tb,)

    tile_bytes = dim * tbr * _LANE * 4
    # Real per-step footprint is ~2 streams * 2 buffers * tile_bytes (tens of
    # KiB); the limit below is generous headroom, far under v7x's 64 MiB VMEM.
    vmem_limit = min(64 * 1024 * 1024, max(8 * 1024 * 1024, 16 * tile_bytes))

    out3 = pl.pallas_call(
        _make_hnn_kernel(dim, hidden),
        out_shape=jax.ShapeDtypeStruct((dim, bp // _LANE, _LANE), x_fm.dtype),
        grid=grid,
        in_specs=[
            pl.BlockSpec(memory_space=pltpu.MemorySpace.SMEM),      # w1 scalars
            pl.BlockSpec(memory_space=pltpu.MemorySpace.SMEM),      # b1 scalars
            pl.BlockSpec(memory_space=pltpu.MemorySpace.SMEM),      # folded symplectic weight
            pl.BlockSpec((dim, tbr, _LANE), lambda i: (0, i, 0)),   # batch tile
        ],
        out_specs=pl.BlockSpec((dim, tbr, _LANE), lambda i: (0, i, 0)),
        compiler_params=pltpu.CompilerParams(
            dimension_semantics=("parallel",),   # batch tiles shard on v7x's 2 TCs
            vmem_limit_bytes=vmem_limit,
        ),
    )(w1_flat, b1_flat, wsym_flat, x3)

    out_fm = out3.reshape(dim, bp)
    if bp != batch:
        out_fm = out_fm[:, :batch]
    return out_fm


@functools.partial(jax.jit, static_argnames=("n", "block_rows"))
def hnn_mass_spring(x, w1_flat, b1_flat, wsym_flat, *, n, block_rows=8192):
    """Module-convention forward: x (B, 2n) -> (B, 2n) = [dH/dp, -dH/dq].

    Thin compatibility wrapper; integrator loops should use the feature-major
    `hnn_mass_spring_fm` to avoid the transposes entirely."""
    assert x.shape[1] == 2 * n
    out_fm = hnn_mass_spring_fm(x.T, w1_flat, b1_flat, wsym_flat,
                                block_rows=block_rows)
    return out_fm.T


def hnn_mass_spring_ref(x, w1, b1, w2, *, n):
    """Pure-JAX reference (autograd through the same MLP Hamiltonian)."""
    hi = jax.lax.Precision.HIGHEST

    def H_sum(xx):
        z = jnp.dot(xx, w1.T, precision=hi) + b1.reshape(1, -1)
        h = jnp.dot(jnp.tanh(z), w2.reshape(-1, 1), precision=hi)  # b2 has no grad effect
        return jnp.sum(h)

    g = jax.grad(H_sum)(x)
    return jnp.concatenate([g[:, n:], -g[:, :n]], axis=1).astype(x.dtype)


if __name__ == "__main__":
    n = 1           # mass-spring: 1 position + 1 momentum coordinate
    hidden = 32     # Hamiltonian MLP hidden width

    key = jax.random.PRNGKey(0)
    kx, k1, k2, k3 = jax.random.split(key, 4)
    w1 = jax.random.normal(k1, (hidden, 2 * n), dtype=jnp.float32) * 0.5
    b1 = jax.random.normal(k2, (hidden,), dtype=jnp.float32) * 0.1
    w2 = jax.random.normal(k3, (hidden,), dtype=jnp.float32) * 0.5

    # One-time weight preparation (hoisted out of the forward).
    params = prepare_hnn_params(w1, b1, w2, n=n)

    # Small batch: exercises the padded, single-tile path.
    x = jax.random.normal(kx, (256, 2 * n), dtype=jnp.float32)
    out = jax.block_until_ready(hnn_mass_spring(x, *params, n=n))
    ref = hnn_mass_spring_ref(x, w1, b1, w2, n=n)
    assert out.shape == x.shape
    assert jnp.allclose(out, ref, atol=1e-5, rtol=1e-5)

    # Larger batch: exercises the multi-tile (2 parallel tiles) path.
    x2 = jax.random.normal(kx, (2048, 2 * n), dtype=jnp.float32)
    out2 = jax.block_until_ready(hnn_mass_spring(x2, *params, n=n))
    ref2 = hnn_mass_spring_ref(x2, w1, b1, w2, n=n)
    assert jnp.allclose(out2, ref2, atol=1e-5, rtol=1e-5)

    # Feature-major fast path (no wrapper transposes) — recommended layout for
    # integrator loops that keep the state feature-major across steps.
    out_fm = jax.block_until_ready(hnn_mass_spring_fm(x2.T, *params))
    assert jnp.allclose(out_fm.T, ref2, atol=1e-5, rtol=1e-5)

    print("KERNEL_OK")
</pallas_src>

<mosaic_0001>
module attributes {stable_mosaic.version = 11 : i64} {
  func.func @kernel(%arg0: i32, %arg1: memref<64xf32, #tpu.memory_space<smem>>, %arg2: memref<32xf32, #tpu.memory_space<smem>>, %arg3: memref<64xf32, #tpu.memory_space<smem>>, %arg4: memref<2x8x128xf32, #tpu.memory_space<vmem>>, %arg5: memref<2x8x128xf32, #tpu.memory_space<vmem>>) attributes {dimension_semantics = [#tpu.dimension_semantics<parallel>], iteration_bounds = array<i64: 1>, scalar_prefetch = 0 : i64, scratch_operands = 0 : i64, tpu.core_type = #tpu.core_type<tc>, window_params = [{transform_indices = @transform_0, window_bounds = array<i64: 64>}, {transform_indices = @transform_1, window_bounds = array<i64: 32>}, {transform_indices = @transform_2, window_bounds = array<i64: 64>}, {transform_indices = @transform_3, window_bounds = array<i64: 2, 8, 128>}, {transform_indices = @transform_4, window_bounds = array<i64: 2, 8, 128>}]} {
    %c0 = arith.constant 0 : index
    %c0_0 = arith.constant 0 : index
    %c0_1 = arith.constant 0 : index
    %0 = vector.load %arg4[%c0, %c0_0, %c0_1] : memref<2x8x128xf32, #tpu.memory_space<vmem>>, vector<1x8x128xf32>
    %1 = vector.shape_cast %0 : vector<1x8x128xf32> to vector<8x128xf32>
    %c1 = arith.constant 1 : index
    %c0_2 = arith.constant 0 : index
    %c0_3 = arith.constant 0 : index
    %2 = vector.load %arg4[%c1, %c0_2, %c0_3] : memref<2x8x128xf32, #tpu.memory_space<vmem>>, vector<1x8x128xf32>
    %3 = vector.shape_cast %2 : vector<1x8x128xf32> to vector<8x128xf32>
    %c0_4 = arith.constant 0 : index
    %4 = memref.load %arg1[%c0_4] : memref<64xf32, #tpu.memory_space<smem>>
    %5 = vector.broadcast %4 : f32 to vector<8x128xf32>
    %6 = arith.mulf %5, %1 : vector<8x128xf32>
    %c1_5 = arith.constant 1 : index
    %7 = memref.load %arg1[%c1_5] : memref<64xf32, #tpu.memory_space<smem>>
    %8 = vector.broadcast %7 : f32 to vector<8x128xf32>
    %9 = arith.mulf %8, %3 : vector<8x128xf32>
    %10 = arith.addf %6, %9 : vector<8x128xf32>
    %c0_6 = arith.constant 0 : index
    %11 = memref.load %arg2[%c0_6] : memref<32xf32, #tpu.memory_space<smem>>
    %12 = vector.broadcast %11 : f32 to vector<8x128xf32>
    %13 = arith.addf %10, %12 : vector<8x128xf32>
    %14 = math.tanh %13 : vector<8x128xf32>
    %15 = arith.mulf %14, %14 : vector<8x128xf32>
    %cst = arith.constant 1.000000e+00 : f32
    %16 = vector.broadcast %cst : f32 to vector<8x128xf32>
    %17 = arith.subf %16, %15 : vector<8x128xf32>
    %c0_7 = arith.constant 0 : index
    %18 = memref.load %arg3[%c0_7] : memref<64xf32, #tpu.memory_space<smem>>
    %19 = vector.broadcast %18 : f32 to vector<8x128xf32>
    %20 = arith.mulf %19, %17 : vector<8x128xf32>
    %c32 = arith.constant 32 : index
    %21 = memref.load %arg3[%c32] : memref<64xf32, #tpu.memory_space<smem>>
    %22 = vector.broadcast %21 : f32 to vector<8x128xf32>
    %23 = arith.mulf %22, %17 : vector<8x128xf32>
    %c2 = arith.constant 2 : index
    %24 = memref.load %arg1[%c2] : memref<64xf32, #tpu.memory_space<smem>>
    %25 = vector.broadcast %24 : f32 to vector<8x128xf32>
    %26 = arith.mulf %25, %1 : vector<8x128xf32>
    %c3 = arith.constant 3 : index
    %27 = memref.load %arg1[%c3] : memref<64xf32, #tpu.memory_space<smem>>
    %28 = vector.broadcast %27 : f32 to vector<8x128xf32>
    %29 = arith.mulf %28, %3 : vector<8x128xf32>
    %30 = arith.addf %26, %29 : vector<8x128xf32>
    %c1_8 = arith.constant 1 : index
    %31 = memref.load %arg2[%c1_8] : memref<32xf32, #tpu.memory_space<smem>>
    %32 = vector.broadcast %31 : f32 to vector<8x128xf32>
    %33 = arith.addf %30, %32 : vector<8x128xf32>
    %34 = math.tanh %33 : vector<8x128xf32>
    %35 = arith.mulf %34, %34 : vector<8x128xf32>
    %cst_9 = arith.constant 1.000000e+00 : f32
    %36 = vector.broadcast %cst_9 : f32 to vector<8x128xf32>
    %37 = arith.subf %36, %35 : vector<8x128xf32>
    %c1_10 = arith.constant 1 : index
    %38 = memref.load %arg3[%c1_10] : memref<64xf32, #tpu.memory_space<smem>>
    %39 = vector.broadcast %38 : f32 to vector<8x128xf32>
    %40 = arith.mulf %39, %37 : vector<8x128xf32>
    %41 = arith.addf %20, %40 : vector<8x128xf32>
    %c33 = arith.constant 33 : index
    %42 = memref.load %arg3[%c33] : memref<64xf32, #tpu.memory_space<smem>>
    %43 = vector.broadcast %42 : f32 to vector<8x128xf32>
    %44 = arith.mulf %43, %37 : vector<8x128xf32>
    %45 = arith.addf %23, %44 : vector<8x128xf32>
    %c4 = arith.constant 4 : index
    %46 = memref.load %arg1[%c4] : memref<64xf32, #tpu.memory_space<smem>>
    %47 = vector.broadcast %46 : f32 to vector<8x128xf32>
    %48 = arith.mulf %47, %1 : vector<8x128xf32>
    %c5 = arith.constant 5 : index
    %49 = memref.load %arg1[%c5] : memref<64xf32, #tpu.memory_space<smem>>
    %50 = vector.broadcast %49 : f32 to vector<8x128xf32>
    %51 = arith.mulf %50, %3 : vector<8x128xf32>
    %52 = arith.addf %48, %51 : vector<8x128xf32>
    %c2_11 = arith.constant 2 : index
    %53 = memref.load %arg2[%c2_11] : memref<32xf32, #tpu.memory_space<smem>>
    %54 = vector.broadcast %53 : f32 to vector<8x128xf32>
    %55 = arith.addf %52, %54 : vector<8x128xf32>
    %56 = math.tanh %55 : vector<8x128xf32>
    %57 = arith.mulf %56, %56 : vector<8x128xf32>
    %cst_12 = arith.constant 1.000000e+00 : f32
    %58 = vector.broadcast %cst_12 : f32 to vector<8x128xf32>
    %59 = arith.subf %58, %57 : vector<8x128xf32>
    %c2_13 = arith.constant 2 : index
    %60 = memref.load %arg3[%c2_13] : memref<64xf32, #tpu.memory_space<smem>>
    %61 = vector.broadcast %60 : f32 to vector<8x128xf32>
    %62 = arith.mulf %61, %59 : vector<8x128xf32>
    %63 = arith.addf %41, %62 : vector<8x128xf32>
    %c34 = arith.constant 34 : index
    %64 = memref.load %arg3[%c34] : memref<64xf32, #tpu.memory_space<smem>>
    %65 = vector.broadcast %64 : f32 to vector<8x128xf32>
    %66 = arith.mulf %65, %59 : vector<8x128xf32>
    %67 = arith.addf %45, %66 : vector<8x128xf32>
    %c6 = arith.constant 6 : index
    %68 = memref.load %arg1[%c6] : memref<64xf32, #tpu.memory_space<smem>>
    %69 = vector.broadcast %68 : f32 to vector<8x128xf32>
    %70 = arith.mulf %69, %1 : vector<8x128xf32>
    %c7 = arith.constant 7 : index
    %71 = memref.load %arg1[%c7] : memref<64xf32, #tpu.memory_space<smem>>
    %72 = vector.broadcast %71 : f32 to vector<8x128xf32>
    %73 = arith.mulf %72, %3 : vector<8x128xf32>
    %74 = arith.addf %70, %73 : vector<8x128xf32>
    %c3_14 = arith.constant 3 : index
    %75 = memref.load %arg2[%c3_14] : memref<32xf32, #tpu.memory_space<smem>>
    %76 = vector.broadcast %75 : f32 to vector<8x128xf32>
    %77 = arith.addf %74, %76 : vector<8x128xf32>
    %78 = math.tanh %77 : vector<8x128xf32>
    %79 = arith.mulf %78, %78 : vector<8x128xf32>
    %cst_15 = arith.constant 1.000000e+00 : f32
    %80 = vector.broadcast %cst_15 : f32 to vector<8x128xf32>
    %81 = arith.subf %80, %79 : vector<8x128xf32>
    %c3_16 = arith.constant 3 : index
    %82 = memref.load %arg3[%c3_16] : memref<64xf32, #tpu.memory_space<smem>>
    %83 = vector.broadcast %82 : f32 to vector<8x128xf32>
    %84 = arith.mulf %83, %81 : vector<8x128xf32>
    %85 = arith.addf %63, %84 : vector<8x128xf32>
    %c35 = arith.constant 35 : index
    %86 = memref.load %arg3[%c35] : memref<64xf32, #tpu.memory_space<smem>>
    %87 = vector.broadcast %86 : f32 to vector<8x128xf32>
    %88 = arith.mulf %87, %81 : vector<8x128xf32>
    %89 = arith.addf %67, %88 : vector<8x128xf32>
    %c8 = arith.constant 8 : index
    %90 = memref.load %arg1[%c8] : memref<64xf32, #tpu.memory_space<smem>>
    %91 = vector.broadcast %90 : f32 to vector<8x128xf32>
    %92 = arith.mulf %91, %1 : vector<8x128xf32>
    %c9 = arith.constant 9 : index
    %93 = memref.load %arg1[%c9] : memref<64xf32, #tpu.memory_space<smem>>
    %94 = vector.broadcast %93 : f32 to vector<8x128xf32>
    %95 = arith.mulf %94, %3 : vector<8x128xf32>
    %96 = arith.addf %92, %95 : vector<8x128xf32>
    %c4_17 = arith.constant 4 : index
    %97 = memref.load %arg2[%c4_17] : memref<32xf32, #tpu.memory_space<smem>>
    %98 = vector.broadcast %97 : f32 to vector<8x128xf32>
    %99 = arith.addf %96, %98 : vector<8x128xf32>
    %100 = math.tanh %99 : vector<8x128xf32>
    %101 = arith.mulf %100, %100 : vector<8x128xf32>
    %cst_18 = arith.constant 1.000000e+00 : f32
    %102 = vector.broadcast %cst_18 : f32 to vector<8x128xf32>
    %103 = arith.subf %102, %101 : vector<8x128xf32>
    %c4_19 = arith.constant 4 : index
    %104 = memref.load %arg3[%c4_19] : memref<64xf32, #tpu.memory_space<smem>>
    %105 = vector.broadcast %104 : f32 to vector<8x128xf32>
    %106 = arith.mulf %105, %103 : vector<8x128xf32>
    %107 = arith.addf %85, %106 : vector<8x128xf32>
    %c36 = arith.constant 36 : index
    %108 = memref.load %arg3[%c36] : memref<64xf32, #tpu.memory_space<smem>>
    %109 = vector.broadcast %108 : f32 to vector<8x128xf32>
    %110 = arith.mulf %109, %103 : vector<8x128xf32>
    %111 = arith.addf %89, %110 : vector<8x128xf32>
    %c10 = arith.constant 10 : index
    %112 = memref.load %arg1[%c10] : memref<64xf32, #tpu.memory_space<smem>>
    %113 = vector.broadcast %112 : f32 to vector<8x128xf32>
    %114 = arith.mulf %113, %1 : vector<8x128xf32>
    %c11 = arith.constant 11 : index
    %115 = memref.load %arg1[%c11] : memref<64xf32, #tpu.memory_space<smem>>
    %116 = vector.broadcast %115 : f32 to vector<8x128xf32>
    %117 = arith.mulf %116, %3 : vector<8x128xf32>
    %118 = arith.addf %114, %117 : vector<8x128xf32>
    %c5_20 = arith.constant 5 : index
    %119 = memref.load %arg2[%c5_20] : memref<32xf32, #tpu.memory_space<smem>>
    %120 = vector.broadcast %119 : f32 to vector<8x128xf32>
    %121 = arith.addf %118, %120 : vector<8x128xf32>
    %122 = math.tanh %121 : vector<8x128xf32>
    %123 = arith.mulf %122, %122 : vector<8x128xf32>
    %cst_21 = arith.constant 1.000000e+00 : f32
    %124 = vector.broadcast %cst_21 : f32 to vector<8x128xf32>
    %125 = arith.subf %124, %123 : vector<8x128xf32>
    %c5_22 = arith.constant 5 : index
    %126 = memref.load %arg3[%c5_22] : memref<64xf32, #tpu.memory_space<smem>>
    %127 = vector.broadcast %126 : f32 to vector<8x128xf32>
    %128 = arith.mulf %127, %125 : vector<8x128xf32>
    %129 = arith.addf %107, %128 : vector<8x128xf32>
    %c37 = arith.constant 37 : index
    %130 = memref.load %arg3[%c37] : memref<64xf32, #tpu.memory_space<smem>>
    %131 = vector.broadcast %130 : f32 to vector<8x128xf32>
    %132 = arith.mulf %131, %125 : vector<8x128xf32>
    %133 = arith.addf %111, %132 : vector<8x128xf32>
    %c12 = arith.constant 12 : index
    %134 = memref.load %arg1[%c12] : memref<64xf32, #tpu.memory_space<smem>>
    %135 = vector.broadcast %134 : f32 to vector<8x128xf32>
    %136 = arith.mulf %135, %1 : vector<8x128xf32>
    %c13 = arith.constant 13 : index
    %137 = memref.load %arg1[%c13] : memref<64xf32, #tpu.memory_space<smem>>
    %138 = vector.broadcast %137 : f32 to vector<8x128xf32>
    %139 = arith.mulf %138, %3 : vector<8x128xf32>
    %140 = arith.addf %136, %139 : vector<8x128xf32>
    %c6_23 = arith.constant 6 : index
    %141 = memref.load %arg2[%c6_23] : memref<32xf32, #tpu.memory_space<smem>>
    %142 = vector.broadcast %141 : f32 to vector<8x128xf32>
    %143 = arith.addf %140, %142 : vector<8x128xf32>
    %144 = math.tanh %143 : vector<8x128xf32>
    %145 = arith.mulf %144, %144 : vector<8x128xf32>
    %cst_24 = arith.constant 1.000000e+00 : f32
    %146 = vector.broadcast %cst_24 : f32 to vector<8x128xf32>
    %147 = arith.subf %146, %145 : vector<8x128xf32>
    %c6_25 = arith.constant 6 : index
    %148 = memref.load %arg3[%c6_25] : memref<64xf32, #tpu.memory_space<smem>>
    %149 = vector.broadcast %148 : f32 to vector<8x128xf32>
    %150 = arith.mulf %149, %147 : vector<8x128xf32>
    %151 = arith.addf %129, %150 : vector<8x128xf32>
    %c38 = arith.constant 38 : index
    %152 = memref.load %arg3[%c38] : memref<64xf32, #tpu.memory_space<smem>>
    %153 = vector.broadcast %152 : f32 to vector<8x128xf32>
    %154 = arith.mulf %153, %147 : vector<8x128xf32>
    %155 = arith.addf %133, %154 : vector<8x128xf32>
    %c14 = arith.constant 14 : index
    %156 = memref.load %arg1[%c14] : memref<64xf32, #tpu.memory_space<smem>>
    %157 = vector.broadcast %156 : f32 to vector<8x128xf32>
    %158 = arith.mulf %157, %1 : vector<8x128xf32>
    %c15 = arith.constant 15 : index
    %159 = memref.load %arg1[%c15] : memref<64xf32, #tpu.memory_space<smem>>
    %160 = vector.broadcast %159 : f32 to vector<8x128xf32>
    %161 = arith.mulf %160, %3 : vector<8x128xf32>
    %162 = arith.addf %158, %161 : vector<8x128xf32>
    %c7_26 = arith.constant 7 : index
    %163 = memref.load %arg2[%c7_26] : memref<32xf32, #tpu.memory_space<smem>>
    %164 = vector.broadcast %163 : f32 to vector<8x128xf32>
    %165 = arith.addf %162, %164 : vector<8x128xf32>
    %166 = math.tanh %165 : vector<8x128xf32>
    %167 = arith.mulf %166, %166 : vector<8x128xf32>
    %cst_27 = arith.constant 1.000000e+00 : f32
    %168 = vector.broadcast %cst_27 : f32 to vector<8x128xf32>
    %169 = arith.subf %168, %167 : vector<8x128xf32>
    %c7_28 = arith.constant 7 : index
    %170 = memref.load %arg3[%c7_28] : memref<64xf32, #tpu.memory_space<smem>>
    %171 = vector.broadcast %170 : f32 to vector<8x128xf32>
    %172 = arith.mulf %171, %169 : vector<8x128xf32>
    %173 = arith.addf %151, %172 : vector<8x128xf32>
    %c39 = arith.constant 39 : index
    %174 = memref.load %arg3[%c39] : memref<64xf32, #tpu.memory_space<smem>>
    %175 = vector.broadcast %174 : f32 to vector<8x128xf32>
    %176 = arith.mulf %175, %169 : vector<8x128xf32>
    %177 = arith.addf %155, %176 : vector<8x128xf32>
    %c16 = arith.constant 16 : index
    %178 = memref.load %arg1[%c16] : memref<64xf32, #tpu.memory_space<smem>>
    %179 = vector.broadcast %178 : f32 to vector<8x128xf32>
    %180 = arith.mulf %179, %1 : vector<8x128xf32>
    %c17 = arith.constant 17 : index
    %181 = memref.load %arg1[%c17] : memref<64xf32, #tpu.memory_space<smem>>
    %182 = vector.broadcast %181 : f32 to vector<8x128xf32>
    %183 = arith.mulf %182, %3 : vector<8x128xf32>
    %184 = arith.addf %180, %183 : vector<8x128xf32>
    %c8_29 = arith.constant 8 : index
    %185 = memref.load %arg2[%c8_29] : memref<32xf32, #tpu.memory_space<smem>>
    %186 = vector.broadcast %185 : f32 to vector<8x128xf32>
    %187 = arith.addf %184, %186 : vector<8x128xf32>
    %188 = math.tanh %187 : vector<8x128xf32>
    %189 = arith.mulf %188, %188 : vector<8x128xf32>
    %cst_30 = arith.constant 1.000000e+00 : f32
    %190 = vector.broadcast %cst_30 : f32 to vector<8x128xf32>
    %191 = arith.subf %190, %189 : vector<8x128xf32>
    %c8_31 = arith.constant 8 : index
    %192 = memref.load %arg3[%c8_31] : memref<64xf32, #tpu.memory_space<smem>>
    %193 = vector.broadcast %192 : f32 to vector<8x128xf32>
    %194 = arith.mulf %193, %191 : vector<8x128xf32>
    %195 = arith.addf %173, %194 : vector<8x128xf32>
    %c40 = arith.constant 40 : index
    %196 = memref.load %arg3[%c40] : memref<64xf32, #tpu.memory_space<smem>>
    %197 = vector.broadcast %196 : f32 to vector<8x128xf32>
    %198 = arith.mulf %197, %191 : vector<8x128xf32>
    %199 = arith.addf %177, %198 : vector<8x128xf32>
    %c18 = arith.constant 18 : index
    %200 = memref.load %arg1[%c18] : memref<64xf32, #tpu.memory_space<smem>>
    %201 = vector.broadcast %200 : f32 to vector<8x128xf32>
    %202 = arith.mulf %201, %1 : vector<8x128xf32>
    %c19 = arith.constant 19 : index
    %203 = memref.load %arg1[%c19] : memref<64xf32, #tpu.memory_space<smem>>
    %204 = vector.broadcast %203 : f32 to vector<8x128xf32>
    %205 = arith.mulf %204, %3 : vector<8x128xf32>
    %206 = arith.addf %202, %205 : vector<8x128xf32>
    %c9_32 = arith.constant 9 : index
    %207 = memref.load %arg2[%c9_32] : memref<32xf32, #tpu.memory_space<smem>>
    %208 = vector.broadcast %207 : f32 to vector<8x128xf32>
    %209 = arith.addf %206, %208 : vector<8x128xf32>
    %210 = math.tanh %209 : vector<8x128xf32>
    %211 = arith.mulf %210, %210 : vector<8x128xf32>
    %cst_33 = arith.constant 1.000000e+00 : f32
    %212 = vector.broadcast %cst_33 : f32 to vector<8x128xf32>
    %213 = arith.subf %212, %211 : vector<8x128xf32>
    %c9_34 = arith.constant 9 : index
    %214 = memref.load %arg3[%c9_34] : memref<64xf32, #tpu.memory_space<smem>>
    %215 = vector.broadcast %214 : f32 to vector<8x128xf32>
    %216 = arith.mulf %215, %213 : vector<8x128xf32>
    %217 = arith.addf %195, %216 : vector<8x128xf32>
    %c41 = arith.constant 41 : index
    %218 = memref.load %arg3[%c41] : memref<64xf32, #tpu.memory_space<smem>>
    %219 = vector.broadcast %218 : f32 to vector<8x128xf32>
    %220 = arith.mulf %219, %213 : vector<8x128xf32>
    %221 = arith.addf %199, %220 : vector<8x128xf32>
    %c20 = arith.constant 20 : index
    %222 = memref.load %arg1[%c20] : memref<64xf32, #tpu.memory_space<smem>>
    %223 = vector.broadcast %222 : f32 to vector<8x128xf32>
    %224 = arith.mulf %223, %1 : vector<8x128xf32>
    %c21 = arith.constant 21 : index
    %225 = memref.load %arg1[%c21] : memref<64xf32, #tpu.memory_space<smem>>
    %226 = vector.broadcast %225 : f32 to vector<8x128xf32>
    %227 = arith.mulf %226, %3 : vector<8x128xf32>
    %228 = arith.addf %224, %227 : vector<8x128xf32>
    %c10_35 = arith.constant 10 : index
    %229 = memref.load %arg2[%c10_35] : memref<32xf32, #tpu.memory_space<smem>>
    %230 = vector.broadcast %229 : f32 to vector<8x128xf32>
    %231 = arith.addf %228, %230 : vector<8x128xf32>
    %232 = math.tanh %231 : vector<8x128xf32>
    %233 = arith.mulf %232, %232 : vector<8x128xf32>
    %cst_36 = arith.constant 1.000000e+00 : f32
    %234 = vector.broadcast %cst_36 : f32 to vector<8x128xf32>
    %235 = arith.subf %234, %233 : vector<8x128xf32>
    %c10_37 = arith.constant 10 : index
    %236 = memref.load %arg3[%c10_37] : memref<64xf32, #tpu.memory_space<smem>>
    %237 = vector.broadcast %236 : f32 to vector<8x128xf32>
    %238 = arith.mulf %237, %235 : vector<8x128xf32>
    %239 = arith.addf %217, %238 : vector<8x128xf32>
    %c42 = arith.constant 42 : index
    %240 = memref.load %arg3[%c42] : memref<64xf32, #tpu.memory_space<smem>>
    %241 = vector.broadcast %240 : f32 to vector<8x128xf32>
    %242 = arith.mulf %241, %235 : vector<8x128xf32>
    %243 = arith.addf %221, %242 : vector<8x128xf32>
    %c22 = arith.constant 22 : index
    %244 = memref.load %arg1[%c22] : memref<64xf32, #tpu.memory_space<smem>>
    %245 = vector.broadcast %244 : f32 to vector<8x128xf32>
    %246 = arith.mulf %245, %1 : vector<8x128xf32>
    %c23 = arith.constant 23 : index
    %247 = memref.load %arg1[%c23] : memref<64xf32, #tpu.memory_space<smem>>
    %248 = vector.broadcast %247 : f32 to vector<8x128xf32>
    %249 = arith.mulf %248, %3 : vector<8x128xf32>
    %250 = arith.addf %246, %249 : vector<8x128xf32>
    %c11_38 = arith.constant 11 : index
    %251 = memref.load %arg2[%c11_38] : memref<32xf32, #tpu.memory_space<smem>>
    %252 = vector.broadcast %251 : f32 to vector<8x128xf32>
    %253 = arith.addf %250, %252 : vector<8x128xf32>
    %254 = math.tanh %253 : vector<8x128xf32>
    %255 = arith.mulf %254, %254 : vector<8x128xf32>
    %cst_39 = arith.constant 1.000000e+00 : f32
    %256 = vector.broadcast %cst_39 : f32 to vector<8x128xf32>
    %257 = arith.subf %256, %255 : vector<8x128xf32>
    %c11_40 = arith.constant 11 : index
    %258 = memref.load %arg3[%c11_40] : memref<64xf32, #tpu.memory_space<smem>>
    %259 = vector.broadcast %258 : f32 to vector<8x128xf32>
    %260 = arith.mulf %259, %257 : vector<8x128xf32>
    %261 = arith.addf %239, %260 : vector<8x128xf32>
    %c43 = arith.constant 43 : index
    %262 = memref.load %arg3[%c43] : memref<64xf32, #tpu.memory_space<smem>>
    %263 = vector.broadcast %262 : f32 to vector<8x128xf32>
    %264 = arith.mulf %263, %257 : vector<8x128xf32>
    %265 = arith.addf %243, %264 : vector<8x128xf32>
    %c24 = arith.constant 24 : index
    %266 = memref.load %arg1[%c24] : memref<64xf32, #tpu.memory_space<smem>>
    %267 = vector.broadcast %266 : f32 to vector<8x128xf32>
    %268 = arith.mulf %267, %1 : vector<8x128xf32>
    %c25 = arith.constant 25 : index
    %269 = memref.load %arg1[%c25] : memref<64xf32, #tpu.memory_space<smem>>
    %270 = vector.broadcast %269 : f32 to vector<8x128xf32>
    %271 = arith.mulf %270, %3 : vector<8x128xf32>
    %272 = arith.addf %268, %271 : vector<8x128xf32>
    %c12_41 = arith.constant 12 : index
    %273 = memref.load %arg2[%c12_41] : memref<32xf32, #tpu.memory_space<smem>>
    %274 = vector.broadcast %273 : f32 to vector<8x128xf32>
    %275 = arith.addf %272, %274 : vector<8x128xf32>
    %276 = math.tanh %275 : vector<8x128xf32>
    %277 = arith.mulf %276, %276 : vector<8x128xf32>
    %cst_42 = arith.constant 1.000000e+00 : f32
    %278 = vector.broadcast %cst_42 : f32 to vector<8x128xf32>
    %279 = arith.subf %278, %277 : vector<8x128xf32>
    %c12_43 = arith.constant 12 : index
    %280 = memref.load %arg3[%c12_43] : memref<64xf32, #tpu.memory_space<smem>>
    %281 = vector.broadcast %280 : f32 to vector<8x128xf32>
    %282 = arith.mulf %281, %279 : vector<8x128xf32>
    %283 = arith.addf %261, %282 : vector<8x128xf32>
    %c44 = arith.constant 44 : index
    %284 = memref.load %arg3[%c44] : memref<64xf32, #tpu.memory_space<smem>>
    %285 = vector.broadcast %284 : f32 to vector<8x128xf32>
    %286 = arith.mulf %285, %279 : vector<8x128xf32>
    %287 = arith.addf %265, %286 : vector<8x128xf32>
    %c26 = arith.constant 26 : index
    %288 = memref.load %arg1[%c26] : memref<64xf32, #tpu.memory_space<smem>>
    %289 = vector.broadcast %288 : f32 to vector<8x128xf32>
    %290 = arith.mulf %289, %1 : vector<8x128xf32>
    %c27 = arith.constant 27 : index
    %291 = memref.load %arg1[%c27] : memref<64xf32, #tpu.memory_space<smem>>
    %292 = vector.broadcast %291 : f32 to vector<8x128xf32>
    %293 = arith.mulf %292, %3 : vector<8x128xf32>
    %294 = arith.addf %290, %293 : vector<8x128xf32>
    %c13_44 = arith.constant 13 : index
    %295 = memref.load %arg2[%c13_44] : memref<32xf32, #tpu.memory_space<smem>>
    %296 = vector.broadcast %295 : f32 to vector<8x128xf32>
    %297 = arith.addf %294, %296 : vector<8x128xf32>
    %298 = math.tanh %297 : vector<8x128xf32>
    %299 = arith.mulf %298, %298 : vector<8x128xf32>
    %cst_45 = arith.constant 1.000000e+00 : f32
    %300 = vector.broadcast %cst_45 : f32 to vector<8x128xf32>
    %301 = arith.subf %300, %299 : vector<8x128xf32>
    %c13_46 = arith.constant 13 : index
    %302 = memref.load %arg3[%c13_46] : memref<64xf32, #tpu.memory_space<smem>>
    %303 = vector.broadcast %302 : f32 to vector<8x128xf32>
    %304 = arith.mulf %303, %301 : vector<8x128xf32>
    %305 = arith.addf %283, %304 : vector<8x128xf32>
    %c45 = arith.constant 45 : index
    %306 = memref.load %arg3[%c45] : memref<64xf32, #tpu.memory_space<smem>>
    %307 = vector.broadcast %306 : f32 to vector<8x128xf32>
    %308 = arith.mulf %307, %301 : vector<8x128xf32>
    %309 = arith.addf %287, %308 : vector<8x128xf32>
    %c28 = arith.constant 28 : index
    %310 = memref.load %arg1[%c28] : memref<64xf32, #tpu.memory_space<smem>>
    %311 = vector.broadcast %310 : f32 to vector<8x128xf32>
    %312 = arith.mulf %311, %1 : vector<8x128xf32>
    %c29 = arith.constant 29 : index
    %313 = memref.load %arg1[%c29] : memref<64xf32, #tpu.memory_space<smem>>
    %314 = vector.broadcast %313 : f32 to vector<8x128xf32>
    %315 = arith.mulf %314, %3 : vector<8x128xf32>
    %316 = arith.addf %312, %315 : vector<8x128xf32>
    %c14_47 = arith.constant 14 : index
    %317 = memref.load %arg2[%c14_47] : memref<32xf32, #tpu.memory_space<smem>>
    %318 = vector.broadcast %317 : f32 to vector<8x128xf32>
    %319 = arith.addf %316, %318 : vector<8x128xf32>
    %320 = math.tanh %319 : vector<8x128xf32>
    %321 = arith.mulf %320, %320 : vector<8x128xf32>
    %cst_48 = arith.constant 1.000000e+00 : f32
    %322 = vector.broadcast %cst_48 : f32 to vector<8x128xf32>
    %323 = arith.subf %322, %321 : vector<8x128xf32>
    %c14_49 = arith.constant 14 : index
    %324 = memref.load %arg3[%c14_49] : memref<64xf32, #tpu.memory_space<smem>>
    %325 = vector.broadcast %324 : f32 to vector<8x128xf32>
    %326 = arith.mulf %325, %323 : vector<8x128xf32>
    %327 = arith.addf %305, %326 : vector<8x128xf32>
    %c46 = arith.constant 46 : index
    %328 = memref.load %arg3[%c46] : memref<64xf32, #tpu.memory_space<smem>>
    %329 = vector.broadcast %328 : f32 to vector<8x128xf32>
    %330 = arith.mulf %329, %323 : vector<8x128xf32>
    %331 = arith.addf %309, %330 : vector<8x128xf32>
    %c30 = arith.constant 30 : index
    %332 = memref.load %arg1[%c30] : memref<64xf32, #tpu.memory_space<smem>>
    %333 = vector.broadcast %332 : f32 to vector<8x128xf32>
    %334 = arith.mulf %333, %1 : vector<8x128xf32>
    %c31 = arith.constant 31 : index
    %335 = memref.load %arg1[%c31] : memref<64xf32, #tpu.memory_space<smem>>
    %336 = vector.broadcast %335 : f32 to vector<8x128xf32>
    %337 = arith.mulf %336, %3 : vector<8x128xf32>
    %338 = arith.addf %334, %337 : vector<8x128xf32>
    %c15_50 = arith.constant 15 : index
    %339 = memref.load %arg2[%c15_50] : memref<32xf32, #tpu.memory_space<smem>>
    %340 = vector.broadcast %339 : f32 to vector<8x128xf32>
    %341 = arith.addf %338, %340 : vector<8x128xf32>
    %342 = math.tanh %341 : vector<8x128xf32>
    %343 = arith.mulf %342, %342 : vector<8x128xf32>
    %cst_51 = arith.constant 1.000000e+00 : f32
    %344 = vector.broadcast %cst_51 : f32 to vector<8x128xf32>
    %345 = arith.subf %344, %343 : vector<8x128xf32>
    %c15_52 = arith.constant 15 : index
    %346 = memref.load %arg3[%c15_52] : memref<64xf32, #tpu.memory_space<smem>>
    %347 = vector.broadcast %346 : f32 to vector<8x128xf32>
    %348 = arith.mulf %347, %345 : vector<8x128xf32>
    %349 = arith.addf %327, %348 : vector<8x128xf32>
    %c47 = arith.constant 47 : index
    %350 = memref.load %arg3[%c47] : memref<64xf32, #tpu.memory_space<smem>>
    %351 = vector.broadcast %350 : f32 to vector<8x128xf32>
    %352 = arith.mulf %351, %345 : vector<8x128xf32>
    %353 = arith.addf %331, %352 : vector<8x128xf32>
    %c32_53 = arith.constant 32 : index
    %354 = memref.load %arg1[%c32_53] : memref<64xf32, #tpu.memory_space<smem>>
    %355 = vector.broadcast %354 : f32 to vector<8x128xf32>
    %356 = arith.mulf %355, %1 : vector<8x128xf32>
    %c33_54 = arith.constant 33 : index
    %357 = memref.load %arg1[%c33_54] : memref<64xf32, #tpu.memory_space<smem>>
    %358 = vector.broadcast %357 : f32 to vector<8x128xf32>
    %359 = arith.mulf %358, %3 : vector<8x128xf32>
    %360 = arith.addf %356, %359 : vector<8x128xf32>
    %c16_55 = arith.constant 16 : index
    %361 = memref.load %arg2[%c16_55] : memref<32xf32, #tpu.memory_space<smem>>
    %362 = vector.broadcast %361 : f32 to vector<8x128xf32>
    %363 = arith.addf %360, %362 : vector<8x128xf32>
    %364 = math.tanh %363 : vector<8x128xf32>
    %365 = arith.mulf %364, %364 : vector<8x128xf32>
    %cst_56 = arith.constant 1.000000e+00 : f32
    %366 = vector.broadcast %cst_56 : f32 to vector<8x128xf32>
    %367 = arith.subf %366, %365 : vector<8x128xf32>
    %c16_57 = arith.constant 16 : index
    %368 = memref.load %arg3[%c16_57] : memref<64xf32, #tpu.memory_space<smem>>
    %369 = vector.broadcast %368 : f32 to vector<8x128xf32>
    %370 = arith.mulf %369, %367 : vector<8x128xf32>
    %371 = arith.addf %349, %370 : vector<8x128xf32>
    %c48 = arith.constant 48 : index
    %372 = memref.load %arg3[%c48] : memref<64xf32, #tpu.memory_space<smem>>
    %373 = vector.broadcast %372 : f32 to vector<8x128xf32>
    %374 = arith.mulf %373, %367 : vector<8x128xf32>
    %375 = arith.addf %353, %374 : vector<8x128xf32>
    %c34_58 = arith.constant 34 : index
    %376 = memref.load %arg1[%c34_58] : memref<64xf32, #tpu.memory_space<smem>>
    %377 = vector.broadcast %376 : f32 to vector<8x128xf32>
    %378 = arith.mulf %377, %1 : vector<8x128xf32>
    %c35_59 = arith.constant 35 : index
    %379 = memref.load %arg1[%c35_59] : memref<64xf32, #tpu.memory_space<smem>>
    %380 = vector.broadcast %379 : f32 to vector<8x128xf32>
    %381 = arith.mulf %380, %3 : vector<8x128xf32>
    %382 = arith.addf %378, %381 : vector<8x128xf32>
    %c17_60 = arith.constant 17 : index
    %383 = memref.load %arg2[%c17_60] : memref<32xf32, #tpu.memory_space<smem>>
    %384 = vector.broadcast %383 : f32 to vector<8x128xf32>
    %385 = arith.addf %382, %384 : vector<8x128xf32>
    %386 = math.tanh %385 : vector<8x128xf32>
    %387 = arith.mulf %386, %386 : vector<8x128xf32>
    %cst_61 = arith.constant 1.000000e+00 : f32
    %388 = vector.broadcast %cst_61 : f32 to vector<8x128xf32>
    %389 = arith.subf %388, %387 : vector<8x128xf32>
    %c17_62 = arith.constant 17 : index
    %390 = memref.load %arg3[%c17_62] : memref<64xf32, #tpu.memory_space<smem>>
    %391 = vector.broadcast %390 : f32 to vector<8x128xf32>
    %392 = arith.mulf %391, %389 : vector<8x128xf32>
    %393 = arith.addf %371, %392 : vector<8x128xf32>
    %c49 = arith.constant 49 : index
    %394 = memref.load %arg3[%c49] : memref<64xf32, #tpu.memory_space<smem>>
    %395 = vector.broadcast %394 : f32 to vector<8x128xf32>
    %396 = arith.mulf %395, %389 : vector<8x128xf32>
    %397 = arith.addf %375, %396 : vector<8x128xf32>
    %c36_63 = arith.constant 36 : index
    %398 = memref.load %arg1[%c36_63] : memref<64xf32, #tpu.memory_space<smem>>
    %399 = vector.broadcast %398 : f32 to vector<8x128xf32>
    %400 = arith.mulf %399, %1 : vector<8x128xf32>
    %c37_64 = arith.constant 37 : index
    %401 = memref.load %arg1[%c37_64] : memref<64xf32, #tpu.memory_space<smem>>
    %402 = vector.broadcast %401 : f32 to vector<8x128xf32>
    %403 = arith.mulf %402, %3 : vector<8x128xf32>
    %404 = arith.addf %400, %403 : vector<8x128xf32>
    %c18_65 = arith.constant 18 : index
    %405 = memref.load %arg2[%c18_65] : memref<32xf32, #tpu.memory_space<smem>>
    %406 = vector.broadcast %405 : f32 to vector<8x128xf32>
    %407 = arith.addf %404, %406 : vector<8x128xf32>
    %408 = math.tanh %407 : vector<8x128xf32>
    %409 = arith.mulf %408, %408 : vector<8x128xf32>
    %cst_66 = arith.constant 1.000000e+00 : f32
    %410 = vector.broadcast %cst_66 : f32 to vector<8x128xf32>
    %411 = arith.subf %410, %409 : vector<8x128xf32>
    %c18_67 = arith.constant 18 : index
    %412 = memref.load %arg3[%c18_67] : memref<64xf32, #tpu.memory_space<smem>>
    %413 = vector.broadcast %412 : f32 to vector<8x128xf32>
    %414 = arith.mulf %413, %411 : vector<8x128xf32>
    %415 = arith.addf %393, %414 : vector<8x128xf32>
    %c50 = arith.constant 50 : index
    %416 = memref.load %arg3[%c50] : memref<64xf32, #tpu.memory_space<smem>>
    %417 = vector.broadcast %416 : f32 to vector<8x128xf32>
    %418 = arith.mulf %417, %411 : vector<8x128xf32>
    %419 = arith.addf %397, %418 : vector<8x128xf32>
    %c38_68 = arith.constant 38 : index
    %420 = memref.load %arg1[%c38_68] : memref<64xf32, #tpu.memory_space<smem>>
    %421 = vector.broadcast %420 : f32 to vector<8x128xf32>
    %422 = arith.mulf %421, %1 : vector<8x128xf32>
    %c39_69 = arith.constant 39 : index
    %423 = memref.load %arg1[%c39_69] : memref<64xf32, #tpu.memory_space<smem>>
    %424 = vector.broadcast %423 : f32 to vector<8x128xf32>
    %425 = arith.mulf %424, %3 : vector<8x128xf32>
    %426 = arith.addf %422, %425 : vector<8x128xf32>
    %c19_70 = arith.constant 19 : index
    %427 = memref.load %arg2[%c19_70] : memref<32xf32, #tpu.memory_space<smem>>
    %428 = vector.broadcast %427 : f32 to vector<8x128xf32>
    %429 = arith.addf %426, %428 : vector<8x128xf32>
    %430 = math.tanh %429 : vector<8x128xf32>
    %431 = arith.mulf %430, %430 : vector<8x128xf32>
    %cst_71 = arith.constant 1.000000e+00 : f32
    %432 = vector.broadcast %cst_71 : f32 to vector<8x128xf32>
    %433 = arith.subf %432, %431 : vector<8x128xf32>
    %c19_72 = arith.constant 19 : index
    %434 = memref.load %arg3[%c19_72] : memref<64xf32, #tpu.memory_space<smem>>
    %435 = vector.broadcast %434 : f32 to vector<8x128xf32>
    %436 = arith.mulf %435, %433 : vector<8x128xf32>
    %437 = arith.addf %415, %436 : vector<8x128xf32>
    %c51 = arith.constant 51 : index
    %438 = memref.load %arg3[%c51] : memref<64xf32, #tpu.memory_space<smem>>
    %439 = vector.broadcast %438 : f32 to vector<8x128xf32>
    %440 = arith.mulf %439, %433 : vector<8x128xf32>
    %441 = arith.addf %419, %440 : vector<8x128xf32>
    %c40_73 = arith.constant 40 : index
    %442 = memref.load %arg1[%c40_73] : memref<64xf32, #tpu.memory_space<smem>>
    %443 = vector.broadcast %442 : f32 to vector<8x128xf32>
    %444 = arith.mulf %443, %1 : vector<8x128xf32>
    %c41_74 = arith.constant 41 : index
    %445 = memref.load %arg1[%c41_74] : memref<64xf32, #tpu.memory_space<smem>>
    %446 = vector.broadcast %445 : f32 to vector<8x128xf32>
    %447 = arith.mulf %446, %3 : vector<8x128xf32>
    %448 = arith.addf %444, %447 : vector<8x128xf32>
    %c20_75 = arith.constant 20 : index
    %449 = memref.load %arg2[%c20_75] : memref<32xf32, #tpu.memory_space<smem>>
    %450 = vector.broadcast %449 : f32 to vector<8x128xf32>
    %451 = arith.addf %448, %450 : vector<8x128xf32>
    %452 = math.tanh %451 : vector<8x128xf32>
    %453 = arith.mulf %452, %452 : vector<8x128xf32>
    %cst_76 = arith.constant 1.000000e+00 : f32
    %454 = vector.broadcast %cst_76 : f32 to vector<8x128xf32>
    %455 = arith.subf %454, %453 : vector<8x128xf32>
    %c20_77 = arith.constant 20 : index
    %456 = memref.load %arg3[%c20_77] : memref<64xf32, #tpu.memory_space<smem>>
    %457 = vector.broadcast %456 : f32 to vector<8x128xf32>
    %458 = arith.mulf %457, %455 : vector<8x128xf32>
    %459 = arith.addf %437, %458 : vector<8x128xf32>
    %c52 = arith.constant 52 : index
    %460 = memref.load %arg3[%c52] : memref<64xf32, #tpu.memory_space<smem>>
    %461 = vector.broadcast %460 : f32 to vector<8x128xf32>
    %462 = arith.mulf %461, %455 : vector<8x128xf32>
    %463 = arith.addf %441, %462 : vector<8x128xf32>
    %c42_78 = arith.constant 42 : index
    %464 = memref.load %arg1[%c42_78] : memref<64xf32, #tpu.memory_space<smem>>
    %465 = vector.broadcast %464 : f32 to vector<8x128xf32>
    %466 = arith.mulf %465, %1 : vector<8x128xf32>
    %c43_79 = arith.constant 43 : index
    %467 = memref.load %arg1[%c43_79] : memref<64xf32, #tpu.memory_space<smem>>
    %468 = vector.broadcast %467 : f32 to vector<8x128xf32>
    %469 = arith.mulf %468, %3 : vector<8x128xf32>
    %470 = arith.addf %466, %469 : vector<8x128xf32>
    %c21_80 = arith.constant 21 : index
    %471 = memref.load %arg2[%c21_80] : memref<32xf32, #tpu.memory_space<smem>>
    %472 = vector.broadcast %471 : f32 to vector<8x128xf32>
    %473 = arith.addf %470, %472 : vector<8x128xf32>
    %474 = math.tanh %473 : vector<8x128xf32>
    %475 = arith.mulf %474, %474 : vector<8x128xf32>
    %cst_81 = arith.constant 1.000000e+00 : f32
    %476 = vector.broadcast %cst_81 : f32 to vector<8x128xf32>
    %477 = arith.subf %476, %475 : vector<8x128xf32>
    %c21_82 = arith.constant 21 : index
    %478 = memref.load %arg3[%c21_82] : memref<64xf32, #tpu.memory_space<smem>>
    %479 = vector.broadcast %478 : f32 to vector<8x128xf32>
    %480 = arith.mulf %479, %477 : vector<8x128xf32>
    %481 = arith.addf %459, %480 : vector<8x128xf32>
    %c53 = arith.constant 53 : index
    %482 = memref.load %arg3[%c53] : memref<64xf32, #tpu.memory_space<smem>>
    %483 = vector.broadcast %482 : f32 to vector<8x128xf32>
    %484 = arith.mulf %483, %477 : vector<8x128xf32>
    %485 = arith.addf %463, %484 : vector<8x128xf32>
    %c44_83 = arith.constant 44 : index
    %486 = memref.load %arg1[%c44_83] : memref<64xf32, #tpu.memory_space<smem>>
    %487 = vector.broadcast %486 : f32 to vector<8x128xf32>
    %488 = arith.mulf %487, %1 : vector<8x128xf32>
    %c45_84 = arith.constant 45 : index
    %489 = memref.load %arg1[%c45_84] : memref<64xf32, #tpu.memory_space<smem>>
    %490 = vector.broadcast %489 : f32 to vector<8x128xf32>
    %491 = arith.mulf %490, %3 : vector<8x128xf32>
    %492 = arith.addf %488, %491 : vector<8x128xf32>
    %c22_85 = arith.constant 22 : index
    %493 = memref.load %arg2[%c22_85] : memref<32xf32, #tpu.memory_space<smem>>
    %494 = vector.broadcast %493 : f32 to vector<8x128xf32>
    %495 = arith.addf %492, %494 : vector<8x128xf32>
    %496 = math.tanh %495 : vector<8x128xf32>
    %497 = arith.mulf %496, %496 : vector<8x128xf32>
    %cst_86 = arith.constant 1.000000e+00 : f32
    %498 = vector.broadcast %cst_86 : f32 to vector<8x128xf32>
    %499 = arith.subf %498, %497 : vector<8x128xf32>
    %c22_87 = arith.constant 22 : index
    %500 = memref.load %arg3[%c22_87] : memref<64xf32, #tpu.memory_space<smem>>
    %501 = vector.broadcast %500 : f32 to vector<8x128xf32>
    %502 = arith.mulf %501, %499 : vector<8x128xf32>
    %503 = arith.addf %481, %502 : vector<8x128xf32>
    %c54 = arith.constant 54 : index
    %504 = memref.load %arg3[%c54] : memref<64xf32, #tpu.memory_space<smem>>
    %505 = vector.broadcast %504 : f32 to vector<8x128xf32>
    %506 = arith.mulf %505, %499 : vector<8x128xf32>
    %507 = arith.addf %485, %506 : vector<8x128xf32>
    %c46_88 = arith.constant 46 : index
    %508 = memref.load %arg1[%c46_88] : memref<64xf32, #tpu.memory_space<smem>>
    %509 = vector.broadcast %508 : f32 to vector<8x128xf32>
    %510 = arith.mulf %509, %1 : vector<8x128xf32>
    %c47_89 = arith.constant 47 : index
    %511 = memref.load %arg1[%c47_89] : memref<64xf32, #tpu.memory_space<smem>>
    %512 = vector.broadcast %511 : f32 to vector<8x128xf32>
    %513 = arith.mulf %512, %3 : vector<8x128xf32>
    %514 = arith.addf %510, %513 : vector<8x128xf32>
    %c23_90 = arith.constant 23 : index
    %515 = memref.load %arg2[%c23_90] : memref<32xf32, #tpu.memory_space<smem>>
    %516 = vector.broadcast %515 : f32 to vector<8x128xf32>
    %517 = arith.addf %514, %516 : vector<8x128xf32>
    %518 = math.tanh %517 : vector<8x128xf32>
    %519 = arith.mulf %518, %518 : vector<8x128xf32>
    %cst_91 = arith.constant 1.000000e+00 : f32
    %520 = vector.broadcast %cst_91 : f32 to vector<8x128xf32>
    %521 = arith.subf %520, %519 : vector<8x128xf32>
    %c23_92 = arith.constant 23 : index
    %522 = memref.load %arg3[%c23_92] : memref<64xf32, #tpu.memory_space<smem>>
    %523 = vector.broadcast %522 : f32 to vector<8x128xf32>
    %524 = arith.mulf %523, %521 : vector<8x128xf32>
    %525 = arith.addf %503, %524 : vector<8x128xf32>
    %c55 = arith.constant 55 : index
    %526 = memref.load %arg3[%c55] : memref<64xf32, #tpu.memory_space<smem>>
    %527 = vector.broadcast %526 : f32 to vector<8x128xf32>
    %528 = arith.mulf %527, %521 : vector<8x128xf32>
    %529 = arith.addf %507, %528 : vector<8x128xf32>
    %c48_93 = arith.constant 48 : index
    %530 = memref.load %arg1[%c48_93] : memref<64xf32, #tpu.memory_space<smem>>
    %531 = vector.broadcast %530 : f32 to vector<8x128xf32>
    %532 = arith.mulf %531, %1 : vector<8x128xf32>
    %c49_94 = arith.constant 49 : index
    %533 = memref.load %arg1[%c49_94] : memref<64xf32, #tpu.memory_space<smem>>
    %534 = vector.broadcast %533 : f32 to vector<8x128xf32>
    %535 = arith.mulf %534, %3 : vector<8x128xf32>
    %536 = arith.addf %532, %535 : vector<8x128xf32>
    %c24_95 = arith.constant 24 : index
    %537 = memref.load %arg2[%c24_95] : memref<32xf32, #tpu.memory_space<smem>>
    %538 = vector.broadcast %537 : f32 to vector<8x128xf32>
    %539 = arith.addf %536, %538 : vector<8x128xf32>
    %540 = math.tanh %539 : vector<8x128xf32>
    %541 = arith.mulf %540, %540 : vector<8x128xf32>
    %cst_96 = arith.constant 1.000000e+00 : f32
    %542 = vector.broadcast %cst_96 : f32 to vector<8x128xf32>
    %543 = arith.subf %542, %541 : vector<8x128xf32>
    %c24_97 = arith.constant 24 : index
    %544 = memref.load %arg3[%c24_97] : memref<64xf32, #tpu.memory_space<smem>>
    %545 = vector.broadcast %544 : f32 to vector<8x128xf32>
    %546 = arith.mulf %545, %543 : vector<8x128xf32>
    %547 = arith.addf %525, %546 : vector<8x128xf32>
    %c56 = arith.constant 56 : index
    %548 = memref.load %arg3[%c56] : memref<64xf32, #tpu.memory_space<smem>>
    %549 = vector.broadcast %548 : f32 to vector<8x128xf32>
    %550 = arith.mulf %549, %543 : vector<8x128xf32>
    %551 = arith.addf %529, %550 : vector<8x128xf32>
    %c50_98 = arith.constant 50 : index
    %552 = memref.load %arg1[%c50_98] : memref<64xf32, #tpu.memory_space<smem>>
    %553 = vector.broadcast %552 : f32 to vector<8x128xf32>
    %554 = arith.mulf %553, %1 : vector<8x128xf32>
    %c51_99 = arith.constant 51 : index
    %555 = memref.load %arg1[%c51_99] : memref<64xf32, #tpu.memory_space<smem>>
    %556 = vector.broadcast %555 : f32 to vector<8x128xf32>
    %557 = arith.mulf %556, %3 : vector<8x128xf32>
    %558 = arith.addf %554, %557 : vector<8x128xf32>
    %c25_100 = arith.constant 25 : index
    %559 = memref.load %arg2[%c25_100] : memref<32xf32, #tpu.memory_space<smem>>
    %560 = vector.broadcast %559 : f32 to vector<8x128xf32>
    %561 = arith.addf %558, %560 : vector<8x128xf32>
    %562 = math.tanh %561 : vector<8x128xf32>
    %563 = arith.mulf %562, %562 : vector<8x128xf32>
    %cst_101 = arith.constant 1.000000e+00 : f32
    %564 = vector.broadcast %cst_101 : f32 to vector<8x128xf32>
    %565 = arith.subf %564, %563 : vector<8x128xf32>
    %c25_102 = arith.constant 25 : index
    %566 = memref.load %arg3[%c25_102] : memref<64xf32, #tpu.memory_space<smem>>
    %567 = vector.broadcast %566 : f32 to vector<8x128xf32>
    %568 = arith.mulf %567, %565 : vector<8x128xf32>
    %569 = arith.addf %547, %568 : vector<8x128xf32>
    %c57 = arith.constant 57 : index
    %570 = memref.load %arg3[%c57] : memref<64xf32, #tpu.memory_space<smem>>
    %571 = vector.broadcast %570 : f32 to vector<8x128xf32>
    %572 = arith.mulf %571, %565 : vector<8x128xf32>
    %573 = arith.addf %551, %572 : vector<8x128xf32>
    %c52_103 = arith.constant 52 : index
    %574 = memref.load %arg1[%c52_103] : memref<64xf32, #tpu.memory_space<smem>>
    %575 = vector.broadcast %574 : f32 to vector<8x128xf32>
    %576 = arith.mulf %575, %1 : vector<8x128xf32>
    %c53_104 = arith.constant 53 : index
    %577 = memref.load %arg1[%c53_104] : memref<64xf32, #tpu.memory_space<smem>>
    %578 = vector.broadcast %577 : f32 to vector<8x128xf32>
    %579 = arith.mulf %578, %3 : vector<8x128xf32>
    %580 = arith.addf %576, %579 : vector<8x128xf32>
    %c26_105 = arith.constant 26 : index
    %581 = memref.load %arg2[%c26_105] : memref<32xf32, #tpu.memory_space<smem>>
    %582 = vector.broadcast %581 : f32 to vector<8x128xf32>
    %583 = arith.addf %580, %582 : vector<8x128xf32>
    %584 = math.tanh %583 : vector<8x128xf32>
    %585 = arith.mulf %584, %584 : vector<8x128xf32>
    %cst_106 = arith.constant 1.000000e+00 : f32
    %586 = vector.broadcast %cst_106 : f32 to vector<8x128xf32>
    %587 = arith.subf %586, %585 : vector<8x128xf32>
    %c26_107 = arith.constant 26 : index
    %588 = memref.load %arg3[%c26_107] : memref<64xf32, #tpu.memory_space<smem>>
    %589 = vector.broadcast %588 : f32 to vector<8x128xf32>
    %590 = arith.mulf %589, %587 : vector<8x128xf32>
    %591 = arith.addf %569, %590 : vector<8x128xf32>
    %c58 = arith.constant 58 : index
    %592 = memref.load %arg3[%c58] : memref<64xf32, #tpu.memory_space<smem>>
    %593 = vector.broadcast %592 : f32 to vector<8x128xf32>
    %594 = arith.mulf %593, %587 : vector<8x128xf32>
    %595 = arith.addf %573, %594 : vector<8x128xf32>
    %c54_108 = arith.constant 54 : index
    %596 = memref.load %arg1[%c54_108] : memref<64xf32, #tpu.memory_space<smem>>
    %597 = vector.broadcast %596 : f32 to vector<8x128xf32>
    %598 = arith.mulf %597, %1 : vector<8x128xf32>
    %c55_109 = arith.constant 55 : index
    %599 = memref.load %arg1[%c55_109] : memref<64xf32, #tpu.memory_space<smem>>
    %600 = vector.broadcast %599 : f32 to vector<8x128xf32>
    %601 = arith.mulf %600, %3 : vector<8x128xf32>
    %602 = arith.addf %598, %601 : vector<8x128xf32>
    %c27_110 = arith.constant 27 : index
    %603 = memref.load %arg2[%c27_110] : memref<32xf32, #tpu.memory_space<smem>>
    %604 = vector.broadcast %603 : f32 to vector<8x128xf32>
    %605 = arith.addf %602, %604 : vector<8x128xf32>
    %606 = math.tanh %605 : vector<8x128xf32>
    %607 = arith.mulf %606, %606 : vector<8x128xf32>
    %cst_111 = arith.constant 1.000000e+00 : f32
    %608 = vector.broadcast %cst_111 : f32 to vector<8x128xf32>
    %609 = arith.subf %608, %607 : vector<8x128xf32>
    %c27_112 = arith.constant 27 : index
    %610 = memref.load %arg3[%c27_112] : memref<64xf32, #tpu.memory_space<smem>>
    %611 = vector.broadcast %610 : f32 to vector<8x128xf32>
    %612 = arith.mulf %611, %609 : vector<8x128xf32>
    %613 = arith.addf %591, %612 : vector<8x128xf32>
    %c59 = arith.constant 59 : index
    %614 = memref.load %arg3[%c59] : memref<64xf32, #tpu.memory_space<smem>>
    %615 = vector.broadcast %614 : f32 to vector<8x128xf32>
    %616 = arith.mulf %615, %609 : vector<8x128xf32>
    %617 = arith.addf %595, %616 : vector<8x128xf32>
    %c56_113 = arith.constant 56 : index
    %618 = memref.load %arg1[%c56_113] : memref<64xf32, #tpu.memory_space<smem>>
    %619 = vector.broadcast %618 : f32 to vector<8x128xf32>
    %620 = arith.mulf %619, %1 : vector<8x128xf32>
    %c57_114 = arith.constant 57 : index
    %621 = memref.load %arg1[%c57_114] : memref<64xf32, #tpu.memory_space<smem>>
    %622 = vector.broadcast %621 : f32 to vector<8x128xf32>
    %623 = arith.mulf %622, %3 : vector<8x128xf32>
    %624 = arith.addf %620, %623 : vector<8x128xf32>
    %c28_115 = arith.constant 28 : index
    %625 = memref.load %arg2[%c28_115] : memref<32xf32, #tpu.memory_space<smem>>
    %626 = vector.broadcast %625 : f32 to vector<8x128xf32>
    %627 = arith.addf %624, %626 : vector<8x128xf32>
    %628 = math.tanh %627 : vector<8x128xf32>
    %629 = arith.mulf %628, %628 : vector<8x128xf32>
    %cst_116 = arith.constant 1.000000e+00 : f32
    %630 = vector.broadcast %cst_116 : f32 to vector<8x128xf32>
    %631 = arith.subf %630, %629 : vector<8x128xf32>
    %c28_117 = arith.constant 28 : index
    %632 = memref.load %arg3[%c28_117] : memref<64xf32, #tpu.memory_space<smem>>
    %633 = vector.broadcast %632 : f32 to vector<8x128xf32>
    %634 = arith.mulf %633, %631 : vector<8x128xf32>
    %635 = arith.addf %613, %634 : vector<8x128xf32>
    %c60 = arith.constant 60 : index
    %636 = memref.load %arg3[%c60] : memref<64xf32, #tpu.memory_space<smem>>
    %637 = vector.broadcast %636 : f32 to vector<8x128xf32>
    %638 = arith.mulf %637, %631 : vector<8x128xf32>
    %639 = arith.addf %617, %638 : vector<8x128xf32>
    %c58_118 = arith.constant 58 : index
    %640 = memref.load %arg1[%c58_118] : memref<64xf32, #tpu.memory_space<smem>>
    %641 = vector.broadcast %640 : f32 to vector<8x128xf32>
    %642 = arith.mulf %641, %1 : vector<8x128xf32>
    %c59_119 = arith.constant 59 : index
    %643 = memref.load %arg1[%c59_119] : memref<64xf32, #tpu.memory_space<smem>>
    %644 = vector.broadcast %643 : f32 to vector<8x128xf32>
    %645 = arith.mulf %644, %3 : vector<8x128xf32>
    %646 = arith.addf %642, %645 : vector<8x128xf32>
    %c29_120 = arith.constant 29 : index
    %647 = memref.load %arg2[%c29_120] : memref<32xf32, #tpu.memory_space<smem>>
    %648 = vector.broadcast %647 : f32 to vector<8x128xf32>
    %649 = arith.addf %646, %648 : vector<8x128xf32>
    %650 = math.tanh %649 : vector<8x128xf32>
    %651 = arith.mulf %650, %650 : vector<8x128xf32>
    %cst_121 = arith.constant 1.000000e+00 : f32
    %652 = vector.broadcast %cst_121 : f32 to vector<8x128xf32>
    %653 = arith.subf %652, %651 : vector<8x128xf32>
    %c29_122 = arith.constant 29 : index
    %654 = memref.load %arg3[%c29_122] : memref<64xf32, #tpu.memory_space<smem>>
    %655 = vector.broadcast %654 : f32 to vector<8x128xf32>
    %656 = arith.mulf %655, %653 : vector<8x128xf32>
    %657 = arith.addf %635, %656 : vector<8x128xf32>
    %c61 = arith.constant 61 : index
    %658 = memref.load %arg3[%c61] : memref<64xf32, #tpu.memory_space<smem>>
    %659 = vector.broadcast %658 : f32 to vector<8x128xf32>
    %660 = arith.mulf %659, %653 : vector<8x128xf32>
    %661 = arith.addf %639, %660 : vector<8x128xf32>
    %c60_123 = arith.constant 60 : index
    %662 = memref.load %arg1[%c60_123] : memref<64xf32, #tpu.memory_space<smem>>
    %663 = vector.broadcast %662 : f32 to vector<8x128xf32>
    %664 = arith.mulf %663, %1 : vector<8x128xf32>
    %c61_124 = arith.constant 61 : index
    %665 = memref.load %arg1[%c61_124] : memref<64xf32, #tpu.memory_space<smem>>
    %666 = vector.broadcast %665 : f32 to vector<8x128xf32>
    %667 = arith.mulf %666, %3 : vector<8x128xf32>
    %668 = arith.addf %664, %667 : vector<8x128xf32>
    %c30_125 = arith.constant 30 : index
    %669 = memref.load %arg2[%c30_125] : memref<32xf32, #tpu.memory_space<smem>>
    %670 = vector.broadcast %669 : f32 to vector<8x128xf32>
    %671 = arith.addf %668, %670 : vector<8x128xf32>
    %672 = math.tanh %671 : vector<8x128xf32>
    %673 = arith.mulf %672, %672 : vector<8x128xf32>
    %cst_126 = arith.constant 1.000000e+00 : f32
    %674 = vector.broadcast %cst_126 : f32 to vector<8x128xf32>
    %675 = arith.subf %674, %673 : vector<8x128xf32>
    %c30_127 = arith.constant 30 : index
    %676 = memref.load %arg3[%c30_127] : memref<64xf32, #tpu.memory_space<smem>>
    %677 = vector.broadcast %676 : f32 to vector<8x128xf32>
    %678 = arith.mulf %677, %675 : vector<8x128xf32>
    %679 = arith.addf %657, %678 : vector<8x128xf32>
    %c62 = arith.constant 62 : index
    %680 = memref.load %arg3[%c62] : memref<64xf32, #tpu.memory_space<smem>>
    %681 = vector.broadcast %680 : f32 to vector<8x128xf32>
    %682 = arith.mulf %681, %675 : vector<8x128xf32>
    %683 = arith.addf %661, %682 : vector<8x128xf32>
    %c62_128 = arith.constant 62 : index
    %684 = memref.load %arg1[%c62_128] : memref<64xf32, #tpu.memory_space<smem>>
    %685 = vector.broadcast %684 : f32 to vector<8x128xf32>
    %686 = arith.mulf %685, %1 : vector<8x128xf32>
    %c63 = arith.constant 63 : index
    %687 = memref.load %arg1[%c63] : memref<64xf32, #tpu.memory_space<smem>>
    %688 = vector.broadcast %687 : f32 to vector<8x128xf32>
    %689 = arith.mulf %688, %3 : vector<8x128xf32>
    %690 = arith.addf %686, %689 : vector<8x128xf32>
    %c31_129 = arith.constant 31 : index
    %691 = memref.load %arg2[%c31_129] : memref<32xf32, #tpu.memory_space<smem>>
    %692 = vector.broadcast %691 : f32 to vector<8x128xf32>
    %693 = arith.addf %690, %692 : vector<8x128xf32>
    %694 = math.tanh %693 : vector<8x128xf32>
    %695 = arith.mulf %694, %694 : vector<8x128xf32>
    %cst_130 = arith.constant 1.000000e+00 : f32
    %696 = vector.broadcast %cst_130 : f32 to vector<8x128xf32>
    %697 = arith.subf %696, %695 : vector<8x128xf32>
    %c31_131 = arith.constant 31 : index
    %698 = memref.load %arg3[%c31_131] : memref<64xf32, #tpu.memory_space<smem>>
    %699 = vector.broadcast %698 : f32 to vector<8x128xf32>
    %700 = arith.mulf %699, %697 : vector<8x128xf32>
    %701 = arith.addf %679, %700 : vector<8x128xf32>
    %c63_132 = arith.constant 63 : index
    %702 = memref.load %arg3[%c63_132] : memref<64xf32, #tpu.memory_space<smem>>
    %703 = vector.broadcast %702 : f32 to vector<8x128xf32>
    %704 = arith.mulf %703, %697 : vector<8x128xf32>
    %705 = arith.addf %683, %704 : vector<8x128xf32>
    %c0_133 = arith.constant 0 : index
    %c0_134 = arith.constant 0 : index
    %c0_135 = arith.constant 0 : index
    %706 = vector.load %arg5[%c0_133, %c0_134, %c0_135] : memref<2x8x128xf32, #tpu.memory_space<vmem>>, vector<1x8x128xf32>
    %707 = vector.shape_cast %706 : vector<1x8x128xf32> to vector<8x128xf32>
    %708 = vector.shape_cast %701 : vector<8x128xf32> to vector<1x8x128xf32>
    tpu.vector_store %arg5[%c0_133, %c0_134, %c0_135], %708 {strides = array<i32>} : memref<2x8x128xf32, #tpu.memory_space<vmem>>, vector<1x8x128xf32>,
    %c1_136 = arith.constant 1 : index
    %c0_137 = arith.constant 0 : index
    %c0_138 = arith.constant 0 : index
    %709 = vector.load %arg5[%c1_136, %c0_137, %c0_138] : memref<2x8x128xf32, #tpu.memory_space<vmem>>, vector<1x8x128xf32>
    %710 = vector.shape_cast %709 : vector<1x8x128xf32> to vector<8x128xf32>
    %711 = vector.shape_cast %705 : vector<8x128xf32> to vector<1x8x128xf32>
    tpu.vector_store %arg5[%c1_136, %c0_137, %c0_138], %711 {strides = array<i32>} : memref<2x8x128xf32, #tpu.memory_space<vmem>>, vector<1x8x128xf32>,
    return
  }
  func.func @transform_0(%arg0: i32) -> i32 {
    %c0_i32 = arith.constant 0 : i32
    %c0_i32_0 = arith.constant 0 : i32
    return %c0_i32 : i32
  }
  func.func @transform_1(%arg0: i32) -> i32 {
    %c0_i32 = arith.constant 0 : i32
    %c0_i32_0 = arith.constant 0 : i32
    return %c0_i32 : i32
  }
  func.func @transform_2(%arg0: i32) -> i32 {
    %c0_i32 = arith.constant 0 : i32
    %c0_i32_0 = arith.constant 0 : i32
    return %c0_i32 : i32
  }
  func.func @transform_3(%arg0: i32) -> (i32, i32, i32) {
    %c0_i32 = arith.constant 0 : i32
    %c0_i32_0 = arith.constant 0 : i32
    %c0_i32_1 = arith.constant 0 : i32
    return %c0_i32, %arg0, %c0_i32_0 : i32, i32, i32
  }
  func.func @transform_4(%arg0: i32) -> (i32, i32, i32) {
    %c0_i32 = arith.constant 0 : i32
    %c0_i32_0 = arith.constant 0 : i32
    %c0_i32_1 = arith.constant 0 : i32
    return %c0_i32, %arg0, %c0_i32_0 : i32, i32, i32
  }
}

</mosaic_0001>

<bundles_post_ra>
// kernel: hnn_mass_spring_fm.1
= control target key start
LH: loop header
LB: loop body
LE: loop exit
PB: predicated region body
PF: predicated region fallthrough
CT: control target
= control target key end

     0   :  { %9 = vsyncpa [#allocation3], 0  ;;  %s1535_s0 = inlined_call_operand.vmem [shape: f32[64], index: 0, kind: input, shape index: {}]   ;;  %s1536_s1 = inlined_call_operand.vmem [shape: f32[32], index: 1, kind: input, shape index: {}]   ;;  %s1537_s2 = inlined_call_operand.vmem [shape: f32[64], index: 2, kind: input, shape index: {}]   ;;  %s1538_s3 = inlined_call_operand.vmem [shape: f32[2,8,128], index: 3, kind: input, shape index: {}]   ;;  %s1539_s4 = inlined_call_operand.vmem [shape: f32[2,8,128], index: 4, kind: output, shape index: {}]  }
   0x1   :  { %10 = vsyncpa [#allocation5], 0  ;;  %s27_s17 = sshll.u32 %s1536_s1, 4  ;;  %s17_s20 = sshll.u32 %s1535_s0, 4  ;;  %s28_s17 = int_to_ptr.vmem [resolvable:$true] %s27_s17  ;;  %s18_s20 = int_to_ptr.vmem [resolvable:$true] %s17_s20 }
   0x2   :  { %s963_s21 = scalar_lea.vmem %s28_s17, 16  ;;  %p968_p1 = scmp.lt.s32.totalorder %s28_s17, %s28_s17 }
   0x3   :  { %p964_p0 = scmp.ne.s32.totalorder %s28_s17, %s963_s21  ;;  %p969_p2 = scmp.lt.s32.totalorder %s963_s21, %s963_s21 }
   0x5   :  { %p970_p3 = por %p969_p2, %p968_p1 }
   0x7   :  { %p971_p4 = pnand %p970_p3, %p964_p0 }
   0x9   :  { %974 = shalt.err (!%p971_p4)
}
   0xa   :  { %s1003_s22 = smov [#allocation4]   ;;  %s975_s23 = scalar_lea.vmem %s18_s20, 16 }
   0xb   :  { %30 = dma.vmem_to_smem %s28_s17, 16, %s1003_s22, [#allocation5]  }
   0xc   :  { %p976_p5 = scmp.ne.s32.totalorder %s18_s20, %s975_s23  ;;  %p980_p6 = scmp.lt.s32.totalorder %s18_s20, %s18_s20 }
   0xd   :  { %p981_p7 = scmp.lt.s32.totalorder %s975_s23, %s975_s23 }
   0xf   :  { %p982_p8 = por %p981_p7, %p980_p6 }
  0x11   :  { %p983_p9 = pnand %p982_p8, %p976_p5 }
  0x13   :  { %986 = shalt.err (!%p983_p9)
}
  0x14   :  { %s1004_s1 = smov [#allocation2]   ;;  %s37_s25 = sshll.u32 %s1537_s2, 4  ;;  %s38_s25 = int_to_ptr.vmem [resolvable:$true] %s37_s25 }
  0x15   :  { %20 = dma.vmem_to_smem %s18_s20, 16, %s1004_s1, [#allocation3]  }
  0x16   :  { %s987_s26 = scalar_lea.vmem %s38_s25, 16  ;;  %p992_p11 = scmp.lt.s32.totalorder %s38_s25, %s38_s25 }
  0x17   :  { %p988_p10 = scmp.ne.s32.totalorder %s38_s25, %s987_s26  ;;  %p993_p12 = scmp.lt.s32.totalorder %s987_s26, %s987_s26 }
  0x19   :  { %p994_p13 = por %p993_p12, %p992_p11 }
  0x1b   :  { %p995_p0 = pnand %p994_p13, %p988_p10 }
  0x1d   :  { %998 = shalt.err (!%p995_p0)
}
  0x1e   :  { %s1005_s27 = smov [#allocation6]  }
  0x1f   :  { %40 = dma.vmem_to_smem %s38_s25, 16, %s1005_s27, [#allocation5]  }
  0x20   :  { %999 = dma.done.wait [#allocation3], 16  }
  0x21   :  { %1000 = vsyncadd [#allocation3], 4294967280 }
  0x22   :  { %1001 = dma.done.wait [#allocation5], 32  }
  0x23   :  { %1002 = vsyncadd [#allocation5], 4294967264 }
  0x24   :  { %52 = sfence }
  0x25   :  { %s56_s28 = sld [smem:[#allocation2]]  ;;  %v1045_v0 = vld [vmem:[%s1538_s3] sm:$0xff]  ;;  %v1050_v1 = vld [vmem:[%s1538_s3 + $0x8] sm:$0xff] }
  0x26   :  { %s736_s29 = sld [smem:[#allocation2 + $0x1]] }
  0x27   :  { %s738_s30 = sld [smem:[#allocation2 + $0x2]] }
  0x28   :  { %s739_s5 = sld [smem:[#allocation2 + $0x3]] }
  0x29   :  { %s63_s2 = sld [smem:[#allocation4]] }
  0x2a   :  { %s1040_s6 = sld [smem:[#allocation4 + $0x1]] }
  0x2b   :  { %v57_v2 = vstv %s56_s28  ;;  %s743_s11 = sld [smem:[#allocation2 + $0x4]] }
  0x2c   :  { %v60_v3 = vstv %s736_s29  ;;  %s744_s12 = sld [smem:[#allocation2 + $0x5]]  ;;  %v58_v6 = vmul.f32 %v57_v2, %v1045_v0 }
  0x2d   :  { %v76_v4 = vstv %s738_s30  ;;  %v61_v7 = vmul.f32 %v1050_v1, %v60_v3  ;;  %s1056_s13 = sld [smem:[#allocation4 + $0x2]] }
  0x2e   :  { %v79_v5 = vstv %s739_s5  ;;  %v77_v8 = vmul.f32 %v76_v4, %v1045_v0  ;;  %s748_s14 = sld [smem:[#allocation2 + $0x6]] }
  0x2f   :  { %v80_v9 = vmul.f32 %v1050_v1, %v79_v5  ;;  %s749_s15 = sld [smem:[#allocation2 + $0x7]]  ;;  %v62_v11 = vadd.f32 %v61_v7, %v58_v6  ;;  %v64_v13 = vstv %s63_s2 }
  0x30   :  { %s1058_s16 = sld [smem:[#allocation6]]  ;;  %v83_v15 = vstv %s1040_s6 }
  0x31   :  { %v97_v10 = vstv %s743_s11  ;;  %v81_v14 = vadd.f32 %v80_v9, %v77_v8  ;;  %s1063_s17 = sld [smem:[#allocation4 + $0x3]]  ;;  %v65_v18 = vadd.f32 %v64_v13, %v62_v11 }
  0x32   :  { %v100_v12 = vstv %s744_s12  ;;  %v98_v16 = vmul.f32 %v97_v10, %v1045_v0  ;;  %s753_s18 = sld [smem:[#allocation2 + $0x8]] }
  0x33   :  { %v101_v17 = vmul.f32 %v1050_v1, %v100_v12  ;;  %s754_s19 = sld [smem:[#allocation2 + $0x9]]  ;;  %v84_v20 = vadd.f32 %v83_v15, %v81_v14  ;;  %v104_v23 = vstv %s1056_s13  ;;  %897 = vtanh.f32 %v65_v18 }
  0x34   :  { %v118_v19 = vstv %s748_s14  ;;  %s1065_s20 = sld [smem:[#allocation6 + $0x20]] }
  0x35   :  { %v121_v21 = vstv %s749_s15  ;;  %s1067_s21 = sld [smem:[#allocation6 + $0x1]]  ;;  %v102_v22 = vadd.f32 %v101_v17, %v98_v16  ;;  %v119_v24 = vmul.f32 %v118_v19, %v1045_v0  ;;  %899 = vtanh.f32 %v84_v20 }
  0x36   :  { %v122_v25 = vmul.f32 %v1050_v1, %v121_v21  ;;  %s755_s22 = sld [smem:[#allocation4 + $0x4]]  ;;  %v70_v59 = vstv %s1058_s16 }
  0x37   :  { %s758_s23 = sld [smem:[#allocation2 + $0xa]]  ;;  %v105_v27 = vadd.f32 %v104_v23, %v102_v22  ;;  %v125_v32 = vstv %s1063_s17 }
  0x38   :  { %v139_v26 = vstv %s753_s18  ;;  %s759_s1 = sld [smem:[#allocation2 + $0xb]]  ;;  %v123_v29 = vadd.f32 %v122_v25, %v119_v24 }
  0x39   :  { %s1072_s0 = sld [smem:[#allocation6 + $0x21]]  ;;  %v142_v28 = vstv %s754_s19  ;;  %v140_v30 = vmul.f32 %v139_v26, %v1045_v0  ;;  %901 = vtanh.f32 %v105_v27 }
  0x3a   :  { %s1074_s24 = sld [smem:[#allocation6 + $0x2]]  ;;  %v143_v31 = vmul.f32 %v1050_v1, %v142_v28  ;;  %v126_v34 = vadd.f32 %v125_v32, %v123_v29  ;;  %v73_v10 = vstv %s1065_s20 }
  0x3b   :  { %s1079_s25 = sld [smem:[#allocation4 + $0x5]]  ;;  %v89_v7 = vstv %s1067_s21 }
  0x3c   :  { %s763_s26 = sld [smem:[#allocation2 + $0xc]]  ;;  %v144_v35 = vadd.f32 %v143_v31, %v140_v30  ;;  %v146_v36 = vstv %s755_s22  ;;  %903 = vtanh.f32 %v126_v34 }
  0x3d   :  { %v160_v33 = vstv %s758_s23  ;;  %s764_s27 = sld [smem:[#allocation2 + $0xd]] }
  0x3e   :  { %s1081_s28 = sld [smem:[#allocation6 + $0x22]]  ;;  %v161_v37 = vmul.f32 %v160_v33, %v1045_v0  ;;  %v163_v38 = vstv %s759_s1  ;;  %v147_v40 = vadd.f32 %v146_v36, %v144_v35 }
  0x3f   :  { %s1083_s29 = sld [smem:[#allocation6 + $0x3]]  ;;  %v164_v39 = vmul.f32 %v1050_v1, %v163_v38  ;;  %v93_v12 = vstv %s1072_s0 }
  0x40   :  { %s1087_s30 = sld [smem:[#allocation4 + $0x6]]  ;;  %v898_v45 = vpop.eup %897  ;;  %905 = vtanh.f32 %v147_v40  ;;  %v110_v19 = vstv %s1074_s24 }
  0x41   :  { %s768_s5 = sld [smem:[#allocation2 + $0xe]]  ;;  %v165_v42 = vadd.f32 %v164_v39, %v161_v37  ;;  %v167_v46 = vstv %s1079_s25  ;;  %v67_v52 = vmul.f32 %v898_v45, %v898_v45 }
  0x42   :  { %v181_v41 = vstv %s763_s26  ;;  %s769_s2 = sld [smem:[#allocation2 + $0xf]]  ;;  %v900_v48 = vpop.eup %899 }
  0x43   :  { %s1089_s6 = sld [smem:[#allocation6 + $0x23]]  ;;  %v182_v43 = vmul.f32 %v181_v41, %v1045_v0  ;;  %v184_v44 = vstv %s764_s27  ;;  %v168_v49 = vadd.f32 %v167_v46, %v165_v42  ;;  %v86_v53 = vmul.f32 %v900_v48, %v900_v48 }
  0x44   :  { %s1092_s7 = sld [smem:[#allocation6 + $0x4]]  ;;  %v185_v47 = vmul.f32 %v1050_v1, %v184_v44  ;;  %v68_v61 = vsub.f32 1.0, %v67_v52  ;;  %v114_v29 = vstv %s1081_s28 }
  0x45   :  { %s1096_s8 = sld [smem:[#allocation4 + $0x7]]  ;;  %907 = vtanh.f32 %v168_v49  ;;  %v87_v62 = vsub.f32 1.0, %v86_v53  ;;  %v131_v35 = vstv %s1083_s29 }
  0x46   :  { %s773_s9 = sld [smem:[#allocation2 + $0x10]]  ;;  %v186_v50 = vadd.f32 %v185_v47, %v182_v43  ;;  %v188_v54 = vstv %s1087_s30  ;;  %v902_v57 = vpop.eup %901  ;;  %v71_v11 = vmul.f32 %v70_v59, %v68_v61  ;;  %v74_v24 = vmul.f32 %v73_v10, %v68_v61 }
  0x47   :  { %v202_v51 = vstv %s768_s5  ;;  %s774_s10 = sld [smem:[#allocation2 + $0x11]]  ;;  %v107_v3 = vmul.f32 %v902_v57, %v902_v57  ;;  %v90_v15 = vmul.f32 %v89_v7, %v87_v62  ;;  %v94_v25 = vmul.f32 %v93_v12, %v87_v62 }
  0x48   :  { %s1098_s11 = sld [smem:[#allocation6 + $0x24]]  ;;  %v203_v55 = vmul.f32 %v202_v51, %v1045_v0  ;;  %v205_v56 = vstv %s769_s2  ;;  %v189_v60 = vadd.f32 %v188_v54, %v186_v50 }
  0x49   :  { %s1102_s12 = sld [smem:[#allocation4 + $0x8]]  ;;  %v206_v58 = vmul.f32 %v1050_v1, %v205_v56  ;;  %v904_v9 = vpop.eup %903  ;;  %v108_v16 = vsub.f32 1.0, %v107_v3  ;;  %v91_v27 = vadd.f32 %v90_v15, %v71_v11  ;;  %v95_v40 = vadd.f32 %v94_v25, %v74_v24 }
  0x4a   :  { %s1104_s13 = sld [smem:[#allocation6 + $0x5]]  ;;  %909 = vtanh.f32 %v189_v60  ;;  %v128_v20 = vmul.f32 %v904_v9, %v904_v9  ;;  %v135_v44 = vstv %s1089_s6  ;;  %v152_v50 = vstv %s1092_s7 }
  0x4b   :  { %s1108_s14 = sld [smem:[#allocation2 + $0x12]]  ;;  %v207_v63 = vadd.f32 %v206_v58, %v203_v55  ;;  %v209_v4 = vstv %s1096_s8  ;;  %v111_v28 = vmul.f32 %v110_v19, %v108_v16  ;;  %v115_v41 = vmul.f32 %v114_v29, %v108_v16 }
  0x4c   :  { %v223_v2 = vstv %s773_s9  ;;  %s1110_s15 = sld [smem:[#allocation2 + $0x13]]  ;;  %v129_v31 = vsub.f32 1.0, %v128_v20 }
  0x4d   :  { %s1112_s17 = sld [smem:[#allocation6 + $0x25]]  ;;  %v224_v5 = vmul.f32 %v223_v2, %v1045_v0  ;;  %v226_v6 = vstv %s774_s10  ;;  %v210_v13 = vadd.f32 %v209_v4, %v207_v63  ;;  %v906_v21 = vpop.eup %905  ;;  %v112_v43 = vadd.f32 %v111_v28, %v91_v27 }
  0x4e   :  { %v227_v8 = vmul.f32 %v1050_v1, %v226_v6  ;;  %s1118_s16 = sld [smem:[#allocation4 + $0x9]]  ;;  %v149_v32 = vmul.f32 %v906_v21, %v906_v21  ;;  %v132_v46 = vmul.f32 %v131_v35, %v129_v31  ;;  %v116_v54 = vadd.f32 %v115_v41, %v95_v40 }
  0x4f   :  { %s1121_s18 = sld [smem:[#allocation6 + $0x6]]  ;;  %v230_v17 = vstv %s1102_s12  ;;  %911 = vtanh.f32 %v210_v13  ;;  %v136_v55 = vmul.f32 %v135_v44, %v129_v31  ;;  %v156_v56 = vstv %s1098_s11 }
  0x50   :  { %v228_v14 = vadd.f32 %v227_v8, %v224_v5  ;;  %s1124_s19 = sld [smem:[#allocation2 + $0x14]]  ;;  %v150_v47 = vsub.f32 1.0, %v149_v32  ;;  %v133_v60 = vadd.f32 %v132_v46, %v112_v43  ;;  %v173_v63 = vstv %s1104_s13 }
  0x51   :  { %v244_v18 = vstv %s1108_s14  ;;  %s1128_s21 = sld [smem:[#allocation2 + $0x15]]  ;;  %v137_v4 = vadd.f32 %v136_v55, %v116_v54 }
  0x52   :  { %s1131_s20 = sld [smem:[#allocation4 + $0xa]]  ;;  %v245_v22 = vmul.f32 %v244_v18, %v1045_v0  ;;  %v247_v23 = vstv %s1110_s15  ;;  %v231_v26 = vadd.f32 %v230_v17, %v228_v14  ;;  %v908_v39 = vpop.eup %907  ;;  %v153_v61 = vmul.f32 %v152_v50, %v150_v47 }
  0x53   :  { %s1133_s22 = sld [smem:[#allocation6 + $0x26]]  ;;  %v248_v30 = vmul.f32 %v1050_v1, %v247_v23  ;;  %v170_v51 = vmul.f32 %v908_v39, %v908_v39  ;;  %v157_v5 = vmul.f32 %v156_v56, %v150_v47  ;;  %v177_v13 = vstv %s1112_s17 }
  0x54   :  { %s1137_s23 = sld [smem:[#allocation6 + $0x7]]  ;;  %v251_v33 = vstv %s1118_s16  ;;  %913 = vtanh.f32 %v231_v26  ;;  %v154_v12 = vadd.f32 %v153_v61, %v133_v60 }
  0x55   :  { %s1141_s1 = sld [smem:[#allocation2 + $0x16]]  ;;  %v249_v36 = vadd.f32 %v248_v30, %v245_v22  ;;  %v171_v62 = vsub.f32 1.0, %v170_v51  ;;  %v194_v19 = vstv %s1121_s18  ;;  %v158_v23 = vadd.f32 %v157_v5, %v137_v4 }
  0x56   :  { %v265_v34 = vstv %s1124_s19  ;;  %s1145_s0 = sld [smem:[#allocation2 + $0x17]] }
  0x57   :  { %s1148_s24 = sld [smem:[#allocation6 + $0x27]]  ;;  %v266_v37 = vmul.f32 %v265_v34, %v1045_v0  ;;  %v268_v38 = vstv %s1128_s21  ;;  %v252_v45 = vadd.f32 %v251_v33, %v249_v36  ;;  %v910_v53 = vpop.eup %909  ;;  %v174_v15 = vmul.f32 %v173_v63, %v171_v62 }
  0x58   :  { %v269_v42 = vmul.f32 %v1050_v1, %v268_v38  ;;  %s1153_s25 = sld [smem:[#allocation4 + $0xb]]  ;;  %v272_v49 = vstv %s1131_s20  ;;  %v191_v2 = vmul.f32 %v910_v53, %v910_v53  ;;  %v178_v25 = vmul.f32 %v177_v13, %v171_v62 }
  0x59   :  { %s1156_s26 = sld [smem:[#allocation6 + $0x8]]  ;;  %915 = vtanh.f32 %v252_v45  ;;  %v175_v28 = vadd.f32 %v174_v15, %v154_v12  ;;  %v198_v31 = vstv %s1133_s22 }
  0x5a   :  { %v270_v48 = vadd.f32 %v269_v42, %v266_v37  ;;  %s1159_s27 = sld [smem:[#allocation2 + $0x18]]  ;;  %v192_v16 = vsub.f32 1.0, %v191_v2  ;;  %v215_v35 = vstv %s1137_s23  ;;  %v179_v39 = vadd.f32 %v178_v25, %v158_v23 }
  0x5b   :  { %v286_v52 = vstv %s1141_s1  ;;  %s1163_s28 = sld [smem:[#allocation2 + $0x19]] }
  0x5c   :  { %s1166_s29 = sld [smem:[#allocation4 + $0xc]]  ;;  %v273_v57 = vadd.f32 %v272_v49, %v270_v48  ;;  %v287_v58 = vmul.f32 %v286_v52, %v1045_v0  ;;  %v289_v59 = vstv %s1145_s0  ;;  %v912_v8 = vpop.eup %911  ;;  %v195_v29 = vmul.f32 %v194_v19, %v192_v16 }
  0x5d   :  { %s1168_s30 = sld [smem:[#allocation6 + $0x28]]  ;;  %v290_v3 = vmul.f32 %v1050_v1, %v289_v59  ;;  %v212_v20 = vmul.f32 %v912_v8, %v912_v8  ;;  %v219_v36 = vstv %s1148_s24  ;;  %v199_v43 = vmul.f32 %v198_v31, %v192_v16 }
  0x5e   :  { %s1172_s5 = sld [smem:[#allocation6 + $0x9]]  ;;  %v293_v6 = vstv %s1153_s25  ;;  %917 = vtanh.f32 %v273_v57  ;;  %v196_v42 = vadd.f32 %v195_v29, %v175_v28 }
  0x5f   :  { %s1176_s2 = sld [smem:[#allocation2 + $0x1a]]  ;;  %v291_v9 = vadd.f32 %v290_v3, %v287_v58  ;;  %v213_v32 = vsub.f32 1.0, %v212_v20  ;;  %v236_v50 = vstv %s1156_s26  ;;  %v200_v56 = vadd.f32 %v199_v43, %v179_v39 }
  0x60   :  { %v307_v7 = vstv %s1159_s27  ;;  %s1180_s6 = sld [smem:[#allocation2 + $0x1b]] }
  0x61   :  { %v308_v10 = vmul.f32 %v307_v7, %v1045_v0  ;;  %v310_v11 = vstv %s1163_s28  ;;  %s1184_s7 = sld [smem:[#allocation4 + $0xd]]  ;;  %v294_v17 = vadd.f32 %v293_v6, %v291_v9  ;;  %v914_v22 = vpop.eup %913  ;;  %v216_v46 = vmul.f32 %v215_v35, %v213_v32 }
  0x62   :  { %s1187_s8 = sld [smem:[#allocation6 + $0x29]]  ;;  %v311_v14 = vmul.f32 %v1050_v1, %v310_v11  ;;  %v314_v18 = vstv %s1166_s29  ;;  %v233_v33 = vmul.f32 %v914_v22, %v914_v22  ;;  %v220_v57 = vmul.f32 %v219_v36, %v213_v32 }
  0x63   :  { %s1190_s9 = sld [smem:[#allocation6 + $0xa]]  ;;  %919 = vtanh.f32 %v294_v17  ;;  %v240_v54 = vstv %s1168_s30  ;;  %v217_v59 = vadd.f32 %v216_v46, %v196_v42 }
  0x64   :  { %v312_v21 = vadd.f32 %v311_v14, %v308_v10  ;;  %s1194_s10 = sld [smem:[#allocation2 + $0x1c]]  ;;  %v234_v47 = vsub.f32 1.0, %v233_v33  ;;  %v257_v4 = vstv %s1172_s5  ;;  %v221_v7 = vadd.f32 %v220_v57, %v200_v56 }
  0x65   :  { %v328_v24 = vstv %s1176_s2  ;;  %s1197_s11 = sld [smem:[#allocation2 + $0x1d]] }
  0x66   :  { %v315_v26 = vadd.f32 %v314_v18, %v312_v21  ;;  %v329_v27 = vmul.f32 %v328_v24, %v1045_v0  ;;  %s1200_s12 = sld [smem:[#allocation4 + $0xe]]  ;;  %v331_v30 = vstv %s1180_s6  ;;  %v916_v38 = vpop.eup %915  ;;  %v237_v60 = vmul.f32 %v236_v50, %v234_v47 }
  0x67   :  { %s1202_s13 = sld [smem:[#allocation6 + $0x2a]]  ;;  %v332_v34 = vmul.f32 %v1050_v1, %v331_v30  ;;  %v335_v37 = vstv %s1184_s7  ;;  %v254_v51 = vmul.f32 %v916_v38, %v916_v38  ;;  %v241_v8 = vmul.f32 %v240_v54, %v234_v47 }
  0x68   :  { %s1206_s14 = sld [smem:[#allocation6 + $0xb]]  ;;  %921 = vtanh.f32 %v315_v26  ;;  %v261_v9 = vstv %s1187_s8  ;;  %v238_v11 = vadd.f32 %v237_v60, %v217_v59 }
  0x69   :  { %s1212_s15 = sld [smem:[#allocation2 + $0x1e]]  ;;  %v333_v40 = vadd.f32 %v332_v34, %v329_v27  ;;  %v255_v63 = vsub.f32 1.0, %v254_v51  ;;  %v278_v18 = vstv %s1190_s9  ;;  %v242_v24 = vadd.f32 %v241_v8, %v221_v7 }
  0x6a   :  { %v349_v41 = vstv %s1194_s10  ;;  %s1215_s17 = sld [smem:[#allocation2 + $0x1f]] }
  0x6b   :  { %v350_v44 = vmul.f32 %v349_v41, %v1045_v0  ;;  %v352_v45 = vstv %s1197_s11  ;;  %s1219_s16 = sld [smem:[#allocation4 + $0xf]]  ;;  %v336_v48 = vadd.f32 %v335_v37, %v333_v40  ;;  %v918_v53 = vpop.eup %917  ;;  %v258_v14 = vmul.f32 %v257_v4, %v255_v63 }
  0x6c   :  { %s1221_s18 = sld [smem:[#allocation6 + $0x2b]]  ;;  %v353_v49 = vmul.f32 %v1050_v1, %v352_v45  ;;  %v356_v52 = vstv %s1200_s12  ;;  %v275_v2 = vmul.f32 %v918_v53, %v918_v53  ;;  %v262_v25 = vmul.f32 %v261_v9, %v255_v63 }
  0x6d   :  { %s1225_s19 = sld [smem:[#allocation6 + $0xc]]  ;;  %923 = vtanh.f32 %v336_v48  ;;  %v259_v27 = vadd.f32 %v258_v14, %v238_v11  ;;  %v282_v30 = vstv %s1202_s13 }
  0x6e   :  { %v354_v55 = vadd.f32 %v353_v49, %v350_v44  ;;  %s1229_s21 = sld [smem:[#allocation2 + $0x20]]  ;;  %v276_v15 = vsub.f32 1.0, %v275_v2  ;;  %v299_v34 = vstv %s1206_s14  ;;  %v263_v38 = vadd.f32 %v262_v25, %v242_v24 }
  0x6f   :  { %v370_v58 = vstv %s1212_s15  ;;  %s1232_s20 = sld [smem:[#allocation2 + $0x21]] }
  0x70   :  { %v357_v61 = vadd.f32 %v356_v52, %v354_v55  ;;  %v371_v62 = vmul.f32 %v370_v58, %v1045_v0  ;;  %s1235_s22 = sld [smem:[#allocation4 + $0x10]]  ;;  %v373_v3 = vstv %s1215_s17  ;;  %v920_v6 = vpop.eup %919  ;;  %v279_v28 = vmul.f32 %v278_v18, %v276_v15 }
  0x71   :  { %s1237_s23 = sld [smem:[#allocation6 + $0x2c]]  ;;  %v374_v5 = vmul.f32 %v1050_v1, %v373_v3  ;;  %v377_v10 = vstv %s1219_s16  ;;  %v296_v19 = vmul.f32 %v920_v6, %v920_v6  ;;  %v283_v41 = vmul.f32 %v282_v30, %v276_v15 }
  0x72   :  { %s1241_s1 = sld [smem:[#allocation6 + $0xd]]  ;;  %925 = vtanh.f32 %v357_v61  ;;  %v303_v39 = vstv %s1221_s18  ;;  %v280_v40 = vadd.f32 %v279_v28, %v259_v27 }
  0x73   :  { %s1246_s0 = sld [smem:[#allocation2 + $0x22]]  ;;  %v375_v12 = vadd.f32 %v374_v5, %v371_v62  ;;  %v297_v31 = vsub.f32 1.0, %v296_v19  ;;  %v320_v51 = vstv %s1225_s19  ;;  %v284_v56 = vadd.f32 %v283_v41, %v263_v38 }
  0x74   :  { %v391_v13 = vstv %s1229_s21  ;;  %s1249_s24 = sld [smem:[#allocation2 + $0x23]] }
  0x75   :  { %s1251_s25 = sld [smem:[#allocation6 + $0x2d]]  ;;  %v392_v16 = vmul.f32 %v391_v13, %v1045_v0  ;;  %v394_v17 = vstv %s1232_s20  ;;  %v378_v20 = vadd.f32 %v377_v10, %v375_v12  ;;  %v922_v22 = vpop.eup %921  ;;  %v300_v43 = vmul.f32 %v299_v34, %v297_v31 }
  0x76   :  { %v395_v21 = vmul.f32 %v1050_v1, %v394_v17  ;;  %s1257_s26 = sld [smem:[#allocation4 + $0x11]]  ;;  %v398_v23 = vstv %s1235_s22  ;;  %v317_v32 = vmul.f32 %v922_v22, %v922_v22  ;;  %v304_v58 = vmul.f32 %v303_v39, %v297_v31 }
  0x77   :  { %s1259_s27 = sld [smem:[#allocation6 + $0xe]]  ;;  %927 = vtanh.f32 %v378_v20  ;;  %v301_v57 = vadd.f32 %v300_v43, %v280_v40  ;;  %v324_v63 = vstv %s1237_s23 }
  0x78   :  { %v396_v26 = vadd.f32 %v395_v21, %v392_v16  ;;  %s1262_s28 = sld [smem:[#allocation2 + $0x24]]  ;;  %v318_v44 = vsub.f32 1.0, %v317_v32  ;;  %v341_v2 = vstv %s1241_s1  ;;  %v305_v8 = vadd.f32 %v304_v58, %v284_v56 }
  0x79   :  { %v412_v29 = vstv %s1246_s0  ;;  %s1265_s29 = sld [smem:[#allocation2 + $0x25]] }
  0x7a   :  { %v399_v33 = vadd.f32 %v398_v23, %v396_v26  ;;  %s1268_s30 = sld [smem:[#allocation4 + $0x12]]  ;;  %v413_v35 = vmul.f32 %v412_v29, %v1045_v0  ;;  %v415_v36 = vstv %s1249_s24  ;;  %v924_v37 = vpop.eup %923  ;;  %v321_v60 = vmul.f32 %v320_v51, %v318_v44 }
  0x7b   :  { %s1271_s5 = sld [smem:[#allocation6 + $0x2e]]  ;;  %v416_v42 = vmul.f32 %v1050_v1, %v415_v36  ;;  %v338_v47 = vmul.f32 %v924_v37, %v924_v37  ;;  %v345_v9 = vstv %s1251_s25  ;;  %v325_v11 = vmul.f32 %v324_v63, %v318_v44 }
  0x7c   :  { %s1276_s2 = sld [smem:[#allocation6 + $0xf]]  ;;  %929 = vtanh.f32 %v399_v33  ;;  %v419_v45 = vstv %s1257_s26  ;;  %v322_v10 = vadd.f32 %v321_v60, %v301_v57 }
  0x7d   :  { %s1279_s6 = sld [smem:[#allocation2 + $0x26]]  ;;  %v417_v48 = vadd.f32 %v416_v42, %v413_v35  ;;  %v339_v61 = vsub.f32 1.0, %v338_v47  ;;  %v362_v18 = vstv %s1259_s27  ;;  %v326_v25 = vadd.f32 %v325_v11, %v305_v8 }
  0x7e   :  { %v433_v46 = vstv %s1262_s28  ;;  %s1283_s7 = sld [smem:[#allocation2 + $0x27]] }
  0x7f   :  { %s1285_s8 = sld [smem:[#allocation6 + $0x2f]]  ;;  %v434_v49 = vmul.f32 %v433_v46, %v1045_v0  ;;  %v436_v50 = vstv %s1265_s29  ;;  %v926_v53 = vpop.eup %925  ;;  %v420_v54 = vadd.f32 %v419_v45, %v417_v48  ;;  %v342_v12 = vmul.f32 %v341_v2, %v339_v61 }
  0x80   :  { %v437_v52 = vmul.f32 %v1050_v1, %v436_v50  ;;  %s1291_s9 = sld [smem:[#allocation4 + $0x13]]  ;;  %v440_v55 = vstv %s1268_s30  ;;  %v359_v3 = vmul.f32 %v926_v53, %v926_v53  ;;  %v346_v26 = vmul.f32 %v345_v9, %v339_v61 }
  0x81   :  { %s1293_s10 = sld [smem:[#allocation6 + $0x10]]  ;;  %931 = vtanh.f32 %v420_v54  ;;  %v366_v23 = vstv %s1271_s5  ;;  %v343_v29 = vadd.f32 %v342_v12, %v322_v10 }
  0x82   :  { %v438_v59 = vadd.f32 %v437_v52, %v434_v49  ;;  %s1296_s11 = sld [smem:[#allocation2 + $0x28]]  ;;  %v360_v14 = vsub.f32 1.0, %v359_v3  ;;  %v383_v33 = vstv %s1276_s2  ;;  %v347_v38 = vadd.f32 %v346_v26, %v326_v25 }
  0x83   :  { %v454_v62 = vstv %s1279_s6  ;;  %s1299_s12 = sld [smem:[#allocation2 + $0x29]] }
  0x84   :  { %v441_v4 = vadd.f32 %v440_v55, %v438_v59  ;;  %s1303_s13 = sld [smem:[#allocation4 + $0x14]]  ;;  %v928_v5 = vpop.eup %927  ;;  %v455_v6 = vmul.f32 %v454_v62, %v1045_v0  ;;  %v457_v7 = vstv %s1283_s7  ;;  %v363_v30 = vmul.f32 %v362_v18, %v360_v14 }
  0x85   :  { %s1305_s14 = sld [smem:[#allocation6 + $0x30]]  ;;  %v458_v13 = vmul.f32 %v1050_v1, %v457_v7  ;;  %v380_v15 = vmul.f32 %v928_v5, %v928_v5  ;;  %v367_v39 = vmul.f32 %v366_v23, %v360_v14  ;;  %v387_v45 = vstv %s1285_s8 }
  0x86   :  { %s1310_s15 = sld [smem:[#allocation6 + $0x11]]  ;;  %933 = vtanh.f32 %v441_v4  ;;  %v461_v16 = vstv %s1291_s9  ;;  %v364_v42 = vadd.f32 %v363_v30, %v343_v29 }
  0x87   :  { %s1313_s17 = sld [smem:[#allocation2 + $0x2a]]  ;;  %v459_v19 = vadd.f32 %v458_v13, %v455_v6  ;;  %v381_v31 = vsub.f32 1.0, %v380_v15  ;;  %v404_v49 = vstv %s1293_s10  ;;  %v368_v53 = vadd.f32 %v367_v39, %v347_v38 }
  0x88   :  { %v475_v17 = vstv %s1296_s11  ;;  %s1317_s16 = sld [smem:[#allocation2 + $0x2b]] }
  0x89   :  { %v476_v20 = vmul.f32 %v475_v17, %v1045_v0  ;;  %v478_v21 = vstv %s1299_s12  ;;  %s1322_s18 = sld [smem:[#allocation4 + $0x15]]  ;;  %v930_v22 = vpop.eup %929  ;;  %v462_v27 = vadd.f32 %v461_v16, %v459_v19  ;;  %v384_v43 = vmul.f32 %v383_v33, %v381_v31 }
  0x8a   :  { %s1325_s19 = sld [smem:[#allocation6 + $0x31]]  ;;  %v479_v24 = vmul.f32 %v1050_v1, %v478_v21  ;;  %v482_v28 = vstv %s1303_s13  ;;  %v401_v34 = vmul.f32 %v930_v22, %v930_v22  ;;  %v388_v58 = vmul.f32 %v387_v45, %v381_v31 }
  0x8b   :  { %s1328_s21 = sld [smem:[#allocation6 + $0x12]]  ;;  %935 = vtanh.f32 %v462_v27  ;;  %v408_v54 = vstv %s1305_s14  ;;  %v385_v57 = vadd.f32 %v384_v43, %v364_v42 }
  0x8c   :  { %v480_v32 = vadd.f32 %v479_v24, %v476_v20  ;;  %s1331_s20 = sld [smem:[#allocation2 + $0x2c]]  ;;  %v402_v46 = vsub.f32 1.0, %v401_v34  ;;  %v425_v3 = vstv %s1310_s15  ;;  %v389_v7 = vadd.f32 %v388_v58, %v368_v53 }
  0x8d   :  { %v496_v35 = vstv %s1313_s17  ;;  %s1335_s22 = sld [smem:[#allocation2 + $0x2d]] }
  0x8e   :  { %v483_v36 = vadd.f32 %v482_v28, %v480_v32  ;;  %v497_v37 = vmul.f32 %v496_v35, %v1045_v0  ;;  %s1338_s23 = sld [smem:[#allocation4 + $0x16]]  ;;  %v499_v40 = vstv %s1317_s16  ;;  %v932_v41 = vpop.eup %931  ;;  %v405_v61 = vmul.f32 %v404_v49, %v402_v46 }
  0x8f   :  { %s1340_s1 = sld [smem:[#allocation6 + $0x32]]  ;;  %v500_v44 = vmul.f32 %v1050_v1, %v499_v40  ;;  %v422_v47 = vmul.f32 %v932_v41, %v932_v41  ;;  %v503_v48 = vstv %s1322_s18  ;;  %v409_v8 = vmul.f32 %v408_v54, %v402_v46 }
  0x90   :  { %s1343_s0 = sld [smem:[#allocation6 + $0x13]]  ;;  %937 = vtanh.f32 %v483_v36  ;;  %v429_v5 = vstv %s1325_s19  ;;  %v406_v11 = vadd.f32 %v405_v61, %v385_v57  ;;  %v1429_v61 = vld [vmem:[%s1538_s3] sm:$0xff] }
  0x91   :  { %s1348_s24 = sld [smem:[#allocation2 + $0x2e]]  ;;  %v501_v50 = vadd.f32 %v500_v44, %v497_v37  ;;  %v423_v62 = vsub.f32 1.0, %v422_v47  ;;  %v446_v16 = vstv %s1328_s21  ;;  %v410_v21 = vadd.f32 %v409_v8, %v389_v7 }
  0x92   :  { %v517_v51 = vstv %s1331_s20  ;;  %s1352_s25 = sld [smem:[#allocation2 + $0x2f]] }
  0x93   :  { %v934_v52 = vpop.eup %933  ;;  %v518_v55 = vmul.f32 %v517_v51, %v1045_v0  ;;  %v520_v56 = vstv %s1335_s22  ;;  %s1357_s26 = sld [smem:[#allocation4 + $0x17]]  ;;  %v504_v59 = vadd.f32 %v503_v48, %v501_v50  ;;  %v426_v12 = vmul.f32 %v425_v3, %v423_v62 }
  0x94   :  { %s1359_s27 = sld [smem:[#allocation6 + $0x33]]  ;;  %v521_v60 = vmul.f32 %v1050_v1, %v520_v56  ;;  %v443_v63 = vmul.f32 %v934_v52, %v934_v52  ;;  %v524_v2 = vstv %s1338_s23  ;;  %v430_v22 = vmul.f32 %v429_v5, %v423_v62 }
  0x95   :  { %s1362_s28 = sld [smem:[#allocation6 + $0x14]]  ;;  %939 = vtanh.f32 %v504_v59  ;;  %v450_v18 = vstv %s1340_s1  ;;  %v427_v26 = vadd.f32 %v426_v12, %v406_v11 }
  0x96   :  { %v522_v4 = vadd.f32 %v521_v60, %v518_v55  ;;  %s1366_s29 = sld [smem:[#allocation2 + $0x30]]  ;;  %v444_v13 = vsub.f32 1.0, %v443_v63  ;;  %v467_v34 = vstv %s1343_s0  ;;  %v431_v36 = vadd.f32 %v430_v22, %v410_v21 }
  0x97   :  { %v538_v6 = vstv %s1348_s24  ;;  %s1370_s30 = sld [smem:[#allocation2 + $0x31]] }
  0x98   :  { %v525_v9 = vadd.f32 %v524_v2, %v522_v4  ;;  %v539_v10 = vmul.f32 %v538_v6, %v1045_v0  ;;  %s1373_s5 = sld [smem:[#allocation4 + $0x18]]  ;;  %v541_v14 = vstv %s1352_s25  ;;  %v936_v15 = vpop.eup %935  ;;  %v447_v27 = vmul.f32 %v446_v16, %v444_v13  ;;  %v1436_v4 = vld [vmem:[%s1538_s3 + $0x8] sm:$0xff] }
  0x99   :  { %s1375_s2 = sld [smem:[#allocation6 + $0x34]]  ;;  %v542_v17 = vmul.f32 %v1050_v1, %v541_v14  ;;  %v464_v19 = vmul.f32 %v936_v15, %v936_v15  ;;  %v545_v20 = vstv %s1357_s26  ;;  %v451_v37 = vmul.f32 %v450_v18, %v444_v13 }
  0x9a   :  { %s1379_s6 = sld [smem:[#allocation6 + $0x15]]  ;;  %941 = vtanh.f32 %v525_v9  ;;  %v471_v39 = vstv %s1359_s27  ;;  %v448_v41 = vadd.f32 %v447_v27, %v427_v26 }
  0x9b   :  { %s1384_s7 = sld [smem:[#allocation2 + $0x32]]  ;;  %v543_v23 = vadd.f32 %v542_v17, %v539_v10  ;;  %v465_v30 = vsub.f32 1.0, %v464_v19  ;;  %v488_v46 = vstv %s1362_s28  ;;  %v452_v49 = vadd.f32 %v451_v37, %v431_v36 }
  0x9c   :  { %v559_v24 = vstv %s1366_s29  ;;  %s1387_s8 = sld [smem:[#allocation2 + $0x33]] }
  0x9d   :  { %v938_v25 = vpop.eup %937  ;;  %s1389_s9 = sld [smem:[#allocation6 + $0x35]]  ;;  %v560_v28 = vmul.f32 %v559_v24, %v1045_v0  ;;  %v562_v29 = vstv %s1370_s30  ;;  %v546_v32 = vadd.f32 %v545_v20, %v543_v23  ;;  %v468_v42 = vmul.f32 %v467_v34, %v465_v30 }
  0x9e   :  { %v485_v31 = vmul.f32 %v938_v25, %v938_v25  ;;  %v563_v33 = vmul.f32 %v1050_v1, %v562_v29  ;;  %s1394_s10 = sld [smem:[#allocation4 + $0x19]]  ;;  %v566_v35 = vstv %s1373_s5  ;;  %v472_v50 = vmul.f32 %v471_v39, %v465_v30 }
  0x9f   :  { %s1397_s11 = sld [smem:[#allocation6 + $0x16]]  ;;  %943 = vtanh.f32 %v546_v32  ;;  %v492_v52 = vstv %s1375_s2  ;;  %v469_v55 = vadd.f32 %v468_v42, %v448_v41 }
  0xa0   :  { %v564_v38 = vadd.f32 %v563_v33, %v560_v28  ;;  %s1400_s12 = sld [smem:[#allocation2 + $0x34]]  ;;  %v486_v43 = vsub.f32 1.0, %v485_v31  ;;  %v509_v53 = vstv %s1379_s6  ;;  %v473_v63 = vadd.f32 %v472_v50, %v452_v49 }
  0xa1   :  { %v580_v40 = vstv %s1384_s7  ;;  %s1404_s13 = sld [smem:[#allocation2 + $0x35]] }
  0xa2   :  { %v567_v44 = vadd.f32 %v566_v35, %v564_v38  ;;  %s1406_s14 = sld [smem:[#allocation4 + $0x1a]]  ;;  %v940_v45 = vpop.eup %939  ;;  %v581_v47 = vmul.f32 %v580_v40, %v1045_v0  ;;  %v583_v48 = vstv %s1387_s8  ;;  %v489_v56 = vmul.f32 %v488_v46, %v486_v43 }
  0xa3   :  { %s1409_s15 = sld [smem:[#allocation6 + $0x36]]  ;;  %v506_v51 = vmul.f32 %v940_v45, %v940_v45  ;;  %v584_v54 = vmul.f32 %v1050_v1, %v583_v48  ;;  %v493_v2 = vmul.f32 %v492_v52, %v486_v43  ;;  %v513_v6 = vstv %s1389_s9 }
  0xa4   :  { %s1413_s17 = sld [smem:[#allocation6 + $0x17]]  ;;  %945 = vtanh.f32 %v567_v44  ;;  %v587_v57 = vstv %s1394_s10  ;;  %v490_v10 = vadd.f32 %v489_v56, %v469_v55 }
  0xa5   :  { %s1418_s16 = sld [smem:[#allocation2 + $0x36]]  ;;  %v507_v59 = vsub.f32 1.0, %v506_v51  ;;  %v585_v60 = vadd.f32 %v584_v54, %v581_v47  ;;  %v494_v13 = vadd.f32 %v493_v2, %v473_v63  ;;  %v530_v18 = vstv %s1397_s11 }
  0xa6   :  { %v601_v58 = vstv %s1400_s12  ;;  %s1422_s18 = sld [smem:[#allocation2 + $0x37]] }
  0xa7   :  { %v942_v0 = vpop.eup %941  ;;  %s1424_s19 = sld [smem:[#allocation6 + $0x37]]  ;;  %v602_v1 = vmul.f32 %v1429_v61, %v601_v58  ;;  %v604_v62 = vstv %s1404_s13  ;;  %v588_v7 = vadd.f32 %v587_v57, %v585_v60  ;;  %v510_v11 = vmul.f32 %v509_v53, %v507_v59 }
  0xa8   :  { %v527_v3 = vmul.f32 %v942_v0, %v942_v0  ;;  %v605_v5 = vmul.f32 %v1436_v4, %v604_v62  ;;  %s1439_s1 = sld [smem:[#allocation4 + $0x1b]]  ;;  %v608_v8 = vstv %s1406_s14  ;;  %v514_v14 = vmul.f32 %v513_v6, %v507_v59 }
  0xa9   :  { %s1442_s0 = sld [smem:[#allocation6 + $0x18]]  ;;  %947 = vtanh.f32 %v588_v7  ;;  %v534_v21 = vstv %s1409_s15  ;;  %v511_v23 = vadd.f32 %v510_v11, %v490_v10 }
  0xaa   :  { %v606_v9 = vadd.f32 %v605_v5, %v602_v1  ;;  %s1445_s24 = sld [smem:[#allocation2 + $0x38]]  ;;  %v528_v15 = vsub.f32 1.0, %v527_v3  ;;  %v515_v25 = vadd.f32 %v514_v14, %v494_v13  ;;  %v551_v35 = vstv %s1413_s17 }
  0xab   :  { %v622_v12 = vstv %s1418_s16  ;;  %s1448_s3 = sld [smem:[#allocation2 + $0x39]] }
  0xac   :  { %v609_v16 = vadd.f32 %v608_v8, %v606_v9  ;;  %s1450_s25 = sld [smem:[#allocation4 + $0x1c]]  ;;  %v944_v17 = vpop.eup %943  ;;  %v623_v19 = vmul.f32 %v1429_v61, %v622_v12  ;;  %v625_v20 = vstv %s1422_s18  ;;  %v531_v26 = vmul.f32 %v530_v18, %v528_v15 }
  0xad   :  { %s1453_s26 = sld [smem:[#allocation6 + $0x38]]  ;;  %v548_v22 = vmul.f32 %v944_v17, %v944_v17  ;;  %v626_v24 = vmul.f32 %v1436_v4, %v625_v20  ;;  %v535_v30 = vmul.f32 %v534_v21, %v528_v15  ;;  %v555_v37 = vstv %s1424_s19 }
  0xae   :  { %s1458_s27 = sld [smem:[#allocation6 + $0x19]]  ;;  %949 = vtanh.f32 %v609_v16  ;;  %v629_v27 = vstv %s1439_s1  ;;  %v532_v42 = vadd.f32 %v531_v26, %v511_v23 }
  0xaf   :  { %s1461_s28 = sld [smem:[#allocation2 + $0x3a]]  ;;  %v627_v31 = vadd.f32 %v626_v24, %v623_v19  ;;  %v549_v34 = vsub.f32 1.0, %v548_v22  ;;  %v536_v43 = vadd.f32 %v535_v30, %v515_v25  ;;  %v572_v52 = vstv %s1442_s0 }
  0xb0   :  { %v643_v28 = vstv %s1445_s24  ;;  %s1465_s29 = sld [smem:[#allocation2 + $0x3b]] }
  0xb1   :  { %v946_v29 = vpop.eup %945  ;;  %v644_v32 = vmul.f32 %v1429_v61, %v643_v28  ;;  %v646_v33 = vstv %s1448_s3  ;;  %s1469_s30 = sld [smem:[#allocation4 + $0x1d]]  ;;  %v630_v39 = vadd.f32 %v629_v27, %v627_v31  ;;  %v552_v45 = vmul.f32 %v551_v35, %v549_v34 }
  0xb2   :  { %s1472_s5 = sld [smem:[#allocation6 + $0x39]]  ;;  %v647_v36 = vmul.f32 %v1436_v4, %v646_v33  ;;  %v569_v38 = vmul.f32 %v946_v29, %v946_v29  ;;  %v650_v40 = vstv %s1450_s25  ;;  %v556_v46 = vmul.f32 %v555_v37, %v549_v34 }
  0xb3   :  { %s1476_s2 = sld [smem:[#allocation6 + $0x1a]]  ;;  %951 = vtanh.f32 %v630_v39  ;;  %v576_v54 = vstv %s1453_s26  ;;  %v553_v58 = vadd.f32 %v552_v45, %v532_v42 }
  0xb4   :  { %v648_v41 = vadd.f32 %v647_v36, %v644_v32  ;;  %s1479_s6 = sld [smem:[#allocation2 + $0x3c]]  ;;  %v570_v49 = vsub.f32 1.0, %v569_v38  ;;  %v593_v56 = vstv %s1458_s27  ;;  %v557_v0 = vadd.f32 %v556_v46, %v536_v43 }
  0xb5   :  { %v664_v44 = vstv %s1461_s28  ;;  %s1482_s7 = sld [smem:[#allocation2 + $0x3d]] }
  0xb6   :  { %v651_v47 = vadd.f32 %v650_v40, %v648_v41  ;;  %v665_v48 = vmul.f32 %v1429_v61, %v664_v44  ;;  %s1485_s8 = sld [smem:[#allocation4 + $0x1e]]  ;;  %v667_v50 = vstv %s1465_s29  ;;  %v948_v51 = vpop.eup %947  ;;  %v573_v62 = vmul.f32 %v572_v52, %v570_v49 }
  0xb7   :  { %s1489_s9 = sld [smem:[#allocation6 + $0x3a]]  ;;  %v668_v53 = vmul.f32 %v1436_v4, %v667_v50  ;;  %v590_v55 = vmul.f32 %v948_v51, %v948_v51  ;;  %v671_v57 = vstv %s1469_s30  ;;  %v577_v5 = vmul.f32 %v576_v54, %v570_v49 }
  0xb8   :  { %953 = vtanh.f32 %v651_v47  ;;  %s1495_s10 = sld [smem:[#allocation2 + $0x3e]]  ;;  %v597_v9 = vstv %s1472_s5  ;;  %v574_v13 = vadd.f32 %v573_v62, %v553_v58 }
  0xb9   :  { %v669_v59 = vadd.f32 %v668_v53, %v665_v48  ;;  %s1498_s11 = sld [smem:[#allocation2 + $0x3f]]  ;;  %v591_v63 = vsub.f32 1.0, %v590_v55  ;;  %v614_v11 = vstv %s1476_s2  ;;  %v578_v17 = vadd.f32 %v577_v5, %v557_v0 }
  0xba   :  { %v685_v60 = vstv %s1479_s6  ;;  %s1502_s12 = sld [smem:[#allocation4 + $0x1f]] }
  0xbb   :  { %v950_v1 = vpop.eup %949  ;;  %v686_v2 = vmul.f32 %v1429_v61, %v685_v60  ;;  %v688_v3 = vstv %s1482_s7  ;;  %s1504_s13 = sld [smem:[#allocation6 + $0x1b]]  ;;  %v672_v7 = vadd.f32 %v671_v57, %v669_v59  ;;  %v594_v14 = vmul.f32 %v593_v56, %v591_v63 }
  0xbc   :  { %v611_v6 = vmul.f32 %v950_v1, %v950_v1  ;;  %v689_v8 = vmul.f32 %v1436_v4, %v688_v3  ;;  %s1508_s14 = sld [smem:[#allocation6 + $0x3b]]  ;;  %v692_v10 = vstv %s1485_s8  ;;  %v598_v18 = vmul.f32 %v597_v9, %v591_v63 }
  0xbd   :  { %955 = vtanh.f32 %v672_v7  ;;  %s1512_s15 = sld [smem:[#allocation6 + $0x1c]]  ;;  %v618_v21 = vstv %s1489_s9  ;;  %v595_v25 = vadd.f32 %v594_v14, %v574_v13 }
  0xbe   :  { %v690_v12 = vadd.f32 %v689_v8, %v686_v2  ;;  %v612_v15 = vsub.f32 1.0, %v611_v6  ;;  %v706_v16 = vstv %s1495_s10  ;;  %s1517_s17 = sld [smem:[#allocation6 + $0x3c]]  ;;  %v599_v29 = vadd.f32 %v598_v18, %v578_v17 }
  0xbf   :  { %v707_v20 = vmul.f32 %v1429_v61, %v706_v16  ;;  %v709_v22 = vstv %s1498_s11  ;;  %s1523_s16 = sld [smem:[#allocation6 + $0x1d]] }
  0xc0   :  { %v693_v19 = vadd.f32 %v692_v10, %v690_v12  ;;  %v952_v23 = vpop.eup %951  ;;  %v710_v24 = vmul.f32 %v1436_v4, %v709_v22  ;;  %v615_v26 = vmul.f32 %v614_v11, %v612_v15  ;;  %v713_v28 = vstv %s1502_s12  ;;  %s882_s18 = sld [smem:[#allocation6 + $0x3d]] }
  0xc1   :  { %v632_v27 = vmul.f32 %v952_v23, %v952_v23  ;;  %v619_v30 = vmul.f32 %v618_v21, %v612_v15  ;;  %v635_v31 = vstv %s1504_s13  ;;  %s886_s19 = sld [smem:[#allocation6 + $0x1e]] }
  0xc2   :  { %957 = vtanh.f32 %v693_v19  ;;  %v711_v61 = vadd.f32 %v710_v24, %v707_v20  ;;  %v639_v34 = vstv %s1508_s14  ;;  %v616_v37 = vadd.f32 %v615_v26, %v595_v25  ;;  %s887_s21 = sld [smem:[#allocation6 + $0x3e]] }
  0xc3   :  { %v633_v33 = vsub.f32 1.0, %v632_v27  ;;  %v656_v38 = vstv %s1512_s15  ;;  %v620_v39 = vadd.f32 %v619_v30, %v599_v29  ;;  %s891_s20 = sld [smem:[#allocation6 + $0x1f]] }
  0xc4   :  { %v714_v36 = vadd.f32 %v713_v28, %v711_v61  ;;  %v660_v42 = vstv %s1517_s17  ;;  %s892_s22 = sld [smem:[#allocation6 + $0x3f]] }
  0xc5   :  { %v954_v32 = vpop.eup %953  ;;  %v636_v4 = vmul.f32 %v635_v31, %v633_v33  ;;  %v640_v40 = vmul.f32 %v639_v34, %v633_v33  ;;  %v677_v49 = vstv %s1523_s16 }
  0xc6   :  { %v653_v35 = vmul.f32 %v954_v32, %v954_v32  ;;  %959 = vtanh.f32 %v714_v36  ;;  %v681_v50 = vstv %s882_s18 }
  0xc7   :  { %v637_v44 = vadd.f32 %v636_v4, %v616_v37  ;;  %v641_v46 = vadd.f32 %v640_v40, %v620_v39  ;;  %v698_v58 = vstv %s886_s19 }
  0xc8   :  { %v654_v41 = vsub.f32 1.0, %v653_v35  ;;  %v702_v0 = vstv %s887_s21 }
  0xc9   :  { %v719_v5 = vstv %s891_s20 }
  0xca   :  { %v956_v43 = vpop.eup %955  ;;  %v657_v45 = vmul.f32 %v656_v38, %v654_v41  ;;  %v661_v47 = vmul.f32 %v660_v42, %v654_v41  ;;  %v723_v6 = vstv %s892_s22 }
  0xcb   :  { %v674_v48 = vmul.f32 %v956_v43, %v956_v43 }
  0xcc   :  { %v658_v53 = vadd.f32 %v657_v45, %v637_v44  ;;  %v662_v54 = vadd.f32 %v661_v47, %v641_v46 }
  0xcd   :  { %v675_v51 = vsub.f32 1.0, %v674_v48 }
  0xcf   :  { %v958_v52 = vpop.eup %957  ;;  %v678_v55 = vmul.f32 %v677_v49, %v675_v51  ;;  %v682_v56 = vmul.f32 %v681_v50, %v675_v51 }
  0xd0   :  { %v695_v57 = vmul.f32 %v958_v52, %v958_v52 }
  0xd1   :  { %v679_v60 = vadd.f32 %v678_v55, %v658_v53  ;;  %v683_v1 = vadd.f32 %v682_v56, %v662_v54 }
  0xd2   :  { %v696_v59 = vsub.f32 1.0, %v695_v57 }
  0xd3   :  { %v960_v2 = vpop.eup %959 }
  0xd4   :  { %v699_v62 = vmul.f32 %v698_v58, %v696_v59  ;;  %v703_v63 = vmul.f32 %v702_v0, %v696_v59  ;;  %v716_v3 = vmul.f32 %v960_v2, %v960_v2 }
  0xd6   :  { %v700_v7 = vadd.f32 %v699_v62, %v679_v60  ;;  %v704_v8 = vadd.f32 %v703_v63, %v683_v1  ;;  %v717_v9 = vsub.f32 1.0, %v716_v3 }
  0xd8   :  { %v720_v10 = vmul.f32 %v719_v5, %v717_v9  ;;  %v724_v11 = vmul.f32 %v723_v6, %v717_v9 }
  0xda   :  { %v721_v12 = vadd.f32 %v720_v10, %v700_v7  ;;  %v725_v13 = vadd.f32 %v724_v11, %v704_v8 }
  0xdc   :  { %726 = vst [vmem:[%s1539_s4] sm:$0xff] %v721_v12  ;;  %893 = vst [vmem:[%s1539_s4 + $0x8] sm:$0xff] %v725_v13 }
  0xdd   :  { %733 = vsyncpa [#allocation3], 1 }
  0xde   :  { %734 = vsyncpa [#allocation5], 1 }

</bundles_post_ra>
